<compile_context>
chip_gen: v7x
topology: tpu7x:2x2x1
jax: 0.10.0
libtpu: 0.0.40
codegen_flags: <defaults>
</compile_context>

<pallas_src>
import functools

import jax
import jax.numpy as jnp
from jax import lax
from jax.experimental import pallas as pl
from jax.experimental.pallas import tpu as pltpu


def _recon_visnet_kernel(x_ref, w_ref, b_ref, o_ref, tap_ref,
                         *, H, W, C1, C2, C3):
    """Fused 4-layer forward for one grid step of B images.

    x_ref:   (1, 1, B*H*W)   input, image b on lanes [b*H*W, (b+1)*H*W)
    w_ref:   (rows_pad, 9*Cmax) packed weight slab (rows: w1 | w2 | w3 | w4)
    b_ref:   (Cmax_pad, 4)      packed biases (column j = layer j+1)
    o_ref:   (1, 1, B*H*W)   output
    tap_ref: (9*Cmax, B*H*W) f32 VMEM scratch holding the im2col operand
    """
    HW = H * W
    BHW = x_ref.shape[2]
    pow2 = (W & (W - 1) == 0) and (HW & (HW - 1) == 0)

    def boundary_masks(c):
        # Boolean masks of shape (c, BHW): w==0, w==W-1, h==0, h==H-1.
        # Periodic per image, hence valid across the lane-folded batch.
        idx = lax.broadcasted_iota(jnp.int32, (c, BHW), 1)
        if pow2:
            pos = idx & (HW - 1)          # flat index within the image
            col = idx & (W - 1)           # column within the row
        else:
            pos = idx % HW                # TODO(synk): vector int mod is slower
            col = pos % W
        return col == 0, col == W - 1, pos < W, pos >= HW - W

    def conv_taps(a):
        """The 9 reflection-padded 3x3 taps of a (c, BHW); tap k = ky*3 + kx."""
        mw0, mwl, mh0, mhl = boundary_masks(a.shape[0])
        # Raw shifted taps via XLU roll: lane p of tap (ky,kx) reads
        # a[(p + (ky-1)*W + (kx-1)) mod BHW].  Wrong values only appear at
        # image-boundary lanes, which the masked fixes below overwrite.
        raw = {}
        for ky in range(3):
            for kx in range(3):
                off = (ky - 1) * W + (kx - 1)
                raw[(ky, kx)] = a if off == 0 else pltpu.roll(a, (-off) % BHW, 1)
        # Column (W-direction) reflection: w==0 uses the right tap, w==W-1 the
        # left tap (padded column -1 -> 1, W -> W-2).
        cfix = {}
        for ky in range(3):
            l, c, r = raw[(ky, 0)], raw[(ky, 1)], raw[(ky, 2)]
            cfix[(ky, 0)] = jnp.where(mw0, r, l)
            cfix[(ky, 1)] = c
            cfix[(ky, 2)] = jnp.where(mwl, l, r)
        # Row (H-direction) reflection: h==0 pulls from the ky=2 taps, h==H-1
        # from the ky=0 taps (padded row -1 -> 1, H -> H-2).
        taps = []
        for ky in range(3):
            for kx in range(3):
                t = cfix[(ky, kx)]
                if ky == 0:
                    t = jnp.where(mh0, cfix[(2, kx)], t)
                elif ky == 2:
                    t = jnp.where(mhl, cfix[(0, kx)], t)
                taps.append(t)
        return taps

    def conv_mm(a, cin, w, b):
        # 3x3 conv as a single im2col MXU matmul (Cout, 9*cin) @ (9*cin, BHW):
        # each masked tap is stored straight into the scratch at static
        # sublane offset k*cin (8-aligned for cin in {16, 32}).
        for k, t in enumerate(conv_taps(a)):
            tap_ref[k * cin:(k + 1) * cin, :] = t
        p = tap_ref[0:9 * cin, :]
        return jnp.dot(w, p, preferred_element_type=jnp.float32) + b

    # ---- CVIS1: 1 -> C1 (cin = 1): pure-VPU rank-1 tap accumulation ---------
    x = x_ref[0].astype(jnp.float32)                      # (1, BHW)
    w1 = w_ref[0:C1, 0:9]                                 # (C1, 9)
    a = jnp.zeros((C1, BHW), jnp.float32)
    for k, t in enumerate(conv_taps(x)):
        a = a + w1[:, k:k + 1] * t                        # (C1,1)*(1,BHW)
    a = jnp.maximum(a + b_ref[0:C1, 0:1], 0.0)            # (C1, BHW)

    # ---- CVIS2: C1 -> C2 and CVIS3: C2 -> C3: one MXU matmul each -----------
    r2, r3, r4 = C1, C1 + C2, C1 + C2 + C3
    a = jnp.maximum(conv_mm(a, C1, w_ref[r2:r3, 0:9 * C1], b_ref[0:C2, 1:2]), 0.0)
    a = jnp.maximum(conv_mm(a, C2, w_ref[r3:r4, 0:9 * C2], b_ref[0:C3, 2:3]), 0.0)

    # ---- CVIS4: C3 -> 1: skinny matmul + fused tanh/2 + 0.5 epilogue --------
    y = conv_mm(a, C3, w_ref[r4:r4 + 1, 0:9 * C3], b_ref[0:1, 3:4])
    o_ref[0] = (jnp.tanh(y) * 0.5 + 0.5).astype(o_ref.dtype)


def prepare_recon_visnet_params(params):
    """One-time repack of PyTorch-style OIHW conv params into two slabs."""
    (w1, b1), (w2, b2), (w3, b3), (w4, b4) = params
    C1, C2, C3 = int(w1.shape[0]), int(w2.shape[0]), int(w3.shape[0])

    # Weight columns ordered tap-major (ky*3 + kx), cin-minor so that column j
    # of each weight matrix matches im2col row j = tap*cin + c.
    w1p = jnp.asarray(w1, jnp.float32).reshape(C1, 9)
    w2p = jnp.transpose(jnp.asarray(w2, jnp.float32), (0, 2, 3, 1)).reshape(C2, 9 * C1)
    w3p = jnp.transpose(jnp.asarray(w3, jnp.float32), (0, 2, 3, 1)).reshape(C3, 9 * C2)
    w4p = jnp.transpose(jnp.asarray(w4, jnp.float32), (0, 2, 3, 1)).reshape(1, 9 * C3)

    rows = C1 + C2 + C3 + 1
    rows_pad = -(-rows // 8) * 8
    cols = max(9, 9 * C1, 9 * C2, 9 * C3)
    wslab = jnp.zeros((rows_pad, cols), jnp.float32)
    wslab = wslab.at[0:C1, 0:9].set(w1p)
    wslab = wslab.at[C1:C1 + C2, 0:9 * C1].set(w2p)
    wslab = wslab.at[C1 + C2:C1 + C2 + C3, 0:9 * C2].set(w3p)
    wslab = wslab.at[rows - 1:rows, 0:9 * C3].set(w4p)

    brow = -(-max(C1, C2, C3, 8) // 8) * 8
    bslab = jnp.zeros((brow, 4), jnp.float32)
    bslab = bslab.at[0:C1, 0].set(jnp.asarray(b1, jnp.float32))
    bslab = bslab.at[0:C2, 1].set(jnp.asarray(b2, jnp.float32))
    bslab = bslab.at[0:C3, 2].set(jnp.asarray(b3, jnp.float32))
    bslab = bslab.at[0:1, 3].set(jnp.asarray(b4, jnp.float32))
    return wslab, bslab, (C1, C2, C3)


# Lane width the batch fold aims for per grid step (im2col scratch stays
# <= 9*32 * 2048 * 4 B ~= 2.4 MiB -- comfortably inside VMEM on v5e/v6e/v7x).
_LANE_TARGET = 2048


def make_recon_visnet_forward(params):
    """Repack params once, return a jitted forward(fusion_nchw) -> (N,1,H,W)."""
    wslab, bslab, (C1, C2, C3) = prepare_recon_visnet_params(params)
    c_max = max(C1, C2, C3)

    @jax.jit
    def forward(fusion_nchw):
        N, cin, H, W = fusion_nchw.shape
        assert cin == 1 and H >= 2 and W >= 2     # ReflectionPad2d(1) needs >= 2
        HW = H * W
        dt = fusion_nchw.dtype

        # Fold the batch onto the lane axis: B images per grid step, keeping
        # >= 2 "parallel" grid steps so both v7x TensorCores get work.
        b_cap = max(1, _LANE_TARGET // HW)
        b_par = max(1, -(-N // 2))
        B = max(1, min(N, b_cap, b_par))
        G = -(-N // B)
        n_pad = G * B
        BHW = B * HW

        x = fusion_nchw.reshape(N, HW)
        if n_pad != N:
            x = jnp.pad(x, ((0, n_pad - N), (0, 0)))
        x = x.reshape(G, 1, BHW)

        out = pl.pallas_call(
            functools.partial(_recon_visnet_kernel,
                              H=H, W=W, C1=C1, C2=C2, C3=C3),
            out_shape=jax.ShapeDtypeStruct((G, 1, BHW), dt),
            grid_spec=pltpu.PrefetchScalarGridSpec(
                num_scalar_prefetch=0,
                grid=(G,),
                in_specs=[
                    pl.BlockSpec((1, 1, BHW), lambda g: (g, 0, 0)),
                    pl.BlockSpec(wslab.shape, lambda g: (0, 0)),
                    pl.BlockSpec(bslab.shape, lambda g: (0, 0)),
                ],
                out_specs=pl.BlockSpec((1, 1, BHW), lambda g: (g, 0, 0)),
                scratch_shapes=[pltpu.VMEM((9 * c_max, BHW), jnp.float32)],
            ),
            compiler_params=pltpu.CompilerParams(
                dimension_semantics=("parallel",)),
        )(x, wslab, bslab)

        return out.reshape(n_pad, 1, H, W)[:N]

    return forward


def init_conv_params(key, cin, cout, k=3):
    """Matches PyTorch Conv2d default init (uniform +-1/sqrt(fan_in))."""
    fan_in = cin * k * k
    bound = 1.0 / jnp.sqrt(jnp.float32(fan_in))
    kw, kb = jax.random.split(key)
    w = jax.random.uniform(kw, (cout, cin, k, k), jnp.float32, -bound, bound)
    b = jax.random.uniform(kb, (cout,), jnp.float32, -bound, bound)
    return w, b


def init_recon_visnet_params(key):
    layer_io = [(1, 16), (16, 32), (32, 16), (16, 1)]
    keys = jax.random.split(key, len(layer_io))
    return [init_conv_params(k, ci, co) for k, (ci, co) in zip(keys, layer_io)]


def _reference_forward(params, fusion_nchw):
    """Pure-JAX (XLA) reference: ReflectionPad2d(1)+Conv2d+act, four layers."""
    x = fusion_nchw
    for i, (w, b) in enumerate(params):
        xp = jnp.pad(x, ((0, 0), (0, 0), (1, 1), (1, 1)), mode="reflect")
        x = lax.conv_general_dilated(
            xp, w, (1, 1), "VALID",
            dimension_numbers=("NCHW", "OIHW", "NCHW"),
            precision=lax.Precision.HIGHEST,
        ) + b[None, :, None, None]
        x = jnp.maximum(x, 0.0) if i < 3 else jnp.tanh(x) * 0.5 + 0.5
    return x


if __name__ == "__main__":
    key = jax.random.PRNGKey(0)
    k_param, k_input = jax.random.split(key)

    params = init_recon_visnet_params(k_param)
    fusion = jax.random.normal(k_input, (2, 1, 16, 16), jnp.float32)   # NCHW

    forward = make_recon_visnet_forward(params)        # one-time param repack
    out = jax.block_until_ready(forward(fusion))
    assert out.shape == (2, 1, 16, 16)

    # Correctness vs. XLA reference.  The all-f32 kernel typically lands around
    # ~1e-5; 5e-3 (4x tighter than before) leaves headroom for reduced-precision
    # MXU f32 pass modes while still catching any tap / reflection / packing bug.
    ref = _reference_forward(params, fusion)
    err = float(jnp.max(jnp.abs(out - ref)))
    assert err < 5e-3, f"max abs error vs reference: {err}"

    print("KERNEL_OK")
</pallas_src>

<mosaic_0001>
module attributes {stable_mosaic.version = 11 : i64} {
  func.func @_recon_visnet_kernel(%arg0: i32, %arg1: memref<1x1x256xf32, #tpu.memory_space<vmem>>, %arg2: memref<72x288xf32, #tpu.memory_space<vmem>>, %arg3: memref<32x4xf32, #tpu.memory_space<vmem>>, %arg4: memref<1x1x256xf32, #tpu.memory_space<vmem>>, %arg5: memref<288x256xf32, #tpu.memory_space<vmem>>) attributes {dimension_semantics = [#tpu.dimension_semantics<parallel>], iteration_bounds = array<i64: 2>, scalar_prefetch = 0 : i64, scratch_operands = 1 : i64, tpu.core_type = #tpu.core_type<tc>, window_params = [{transform_indices = @transform_0, window_bounds = array<i64: 1, 1, 256>}, {pipeline_mode = #tpu.pipeline_mode<synchronous>, transform_indices = @transform_1, window_bounds = array<i64: 72, 288>}, {pipeline_mode = #tpu.pipeline_mode<synchronous>, transform_indices = @transform_2, window_bounds = array<i64: 32, 4>}, {transform_indices = @transform_3, window_bounds = array<i64: 1, 1, 256>}]} {
    %c0 = arith.constant 0 : index
    %c0_0 = arith.constant 0 : index
    %c0_1 = arith.constant 0 : index
    %0 = vector.load %arg1[%c0, %c0_0, %c0_1] : memref<1x1x256xf32, #tpu.memory_space<vmem>>, vector<1x1x256xf32>
    %1 = vector.shape_cast %0 : vector<1x1x256xf32> to vector<1x256xf32>
    %c0_2 = arith.constant 0 : index
    %c0_3 = arith.constant 0 : index
    %2 = vector.load %arg2[%c0_2, %c0_3] : memref<72x288xf32, #tpu.memory_space<vmem>>, vector<16x9xf32>
    %cst = arith.constant 0.000000e+00 : f32
    %3 = vector.broadcast %cst : f32 to vector<16x256xf32>
    %4 = tpu.iota {dimensions = array<i32: 1>} : vector<1x256xi32>
    %c255_i32 = arith.constant 255 : i32
    %5 = vector.broadcast %c255_i32 : i32 to vector<1x256xi32>
    %6 = arith.andi %4, %5 : vector<1x256xi32>
    %c15_i32 = arith.constant 15 : i32
    %7 = vector.broadcast %c15_i32 : i32 to vector<1x256xi32>
    %8 = arith.andi %4, %7 : vector<1x256xi32>
    %c0_i32 = arith.constant 0 : i32
    %9 = vector.broadcast %c0_i32 : i32 to vector<1x256xi32>
    %10 = arith.cmpi eq, %8, %9 : vector<1x256xi32>
    %c15_i32_4 = arith.constant 15 : i32
    %11 = vector.broadcast %c15_i32_4 : i32 to vector<1x256xi32>
    %12 = arith.cmpi eq, %8, %11 : vector<1x256xi32>
    %c16_i32 = arith.constant 16 : i32
    %13 = vector.broadcast %c16_i32 : i32 to vector<1x256xi32>
    %14 = arith.cmpi slt, %6, %13 : vector<1x256xi32>
    %c240_i32 = arith.constant 240 : i32
    %15 = vector.broadcast %c240_i32 : i32 to vector<1x256xi32>
    %16 = arith.cmpi sge, %6, %15 : vector<1x256xi32>
    %c17_i32 = arith.constant 17 : i32
    %17 = tpu.dynamic_rotate %1 by %c17_i32 dim 1 : vector<1x256xf32>, i32 -> vector<1x256xf32>
    %c16_i32_5 = arith.constant 16 : i32
    %18 = tpu.dynamic_rotate %1 by %c16_i32_5 dim 1 : vector<1x256xf32>, i32 -> vector<1x256xf32>
    %c15_i32_6 = arith.constant 15 : i32
    %19 = tpu.dynamic_rotate %1 by %c15_i32_6 dim 1 : vector<1x256xf32>, i32 -> vector<1x256xf32>
    %c1_i32 = arith.constant 1 : i32
    %20 = tpu.dynamic_rotate %1 by %c1_i32 dim 1 : vector<1x256xf32>, i32 -> vector<1x256xf32>
    %c255_i32_7 = arith.constant 255 : i32
    %21 = tpu.dynamic_rotate %1 by %c255_i32_7 dim 1 : vector<1x256xf32>, i32 -> vector<1x256xf32>
    %c241_i32 = arith.constant 241 : i32
    %22 = tpu.dynamic_rotate %1 by %c241_i32 dim 1 : vector<1x256xf32>, i32 -> vector<1x256xf32>
    %c240_i32_8 = arith.constant 240 : i32
    %23 = tpu.dynamic_rotate %1 by %c240_i32_8 dim 1 : vector<1x256xf32>, i32 -> vector<1x256xf32>
    %c239_i32 = arith.constant 239 : i32
    %24 = tpu.dynamic_rotate %1 by %c239_i32 dim 1 : vector<1x256xf32>, i32 -> vector<1x256xf32>
    %25 = arith.select %10, %19, %17 : vector<1x256xi1>, vector<1x256xf32>
    %26 = arith.select %12, %17, %19 : vector<1x256xi1>, vector<1x256xf32>
    %27 = arith.select %10, %21, %20 : vector<1x256xi1>, vector<1x256xf32>
    %28 = arith.select %12, %20, %21 : vector<1x256xi1>, vector<1x256xf32>
    %29 = arith.select %10, %24, %22 : vector<1x256xi1>, vector<1x256xf32>
    %30 = arith.select %12, %22, %24 : vector<1x256xi1>, vector<1x256xf32>
    %31 = arith.select %14, %29, %25 : vector<1x256xi1>, vector<1x256xf32>
    %32 = arith.select %14, %23, %18 : vector<1x256xi1>, vector<1x256xf32>
    %33 = arith.select %14, %30, %26 : vector<1x256xi1>, vector<1x256xf32>
    %34 = arith.select %16, %25, %29 : vector<1x256xi1>, vector<1x256xf32>
    %35 = arith.select %16, %18, %23 : vector<1x256xi1>, vector<1x256xf32>
    %36 = arith.select %16, %26, %30 : vector<1x256xi1>, vector<1x256xf32>
    %37 = vector.extract_strided_slice %2 {offsets = [0, 0], sizes = [16, 1], strides = [1, 1]} : vector<16x9xf32> to vector<16x1xf32>
    %38 = vector.broadcast %37 : vector<16x1xf32> to vector<16x256xf32>
    %39 = vector.broadcast %31 : vector<1x256xf32> to vector<16x256xf32>
    %40 = arith.mulf %38, %39 : vector<16x256xf32>
    %41 = arith.addf %3, %40 : vector<16x256xf32>
    %42 = vector.extract_strided_slice %2 {offsets = [0, 1], sizes = [16, 1], strides = [1, 1]} : vector<16x9xf32> to vector<16x1xf32>
    %43 = vector.broadcast %42 : vector<16x1xf32> to vector<16x256xf32>
    %44 = vector.broadcast %32 : vector<1x256xf32> to vector<16x256xf32>
    %45 = arith.mulf %43, %44 : vector<16x256xf32>
    %46 = arith.addf %41, %45 : vector<16x256xf32>
    %47 = vector.extract_strided_slice %2 {offsets = [0, 2], sizes = [16, 1], strides = [1, 1]} : vector<16x9xf32> to vector<16x1xf32>
    %48 = vector.broadcast %47 : vector<16x1xf32> to vector<16x256xf32>
    %49 = vector.broadcast %33 : vector<1x256xf32> to vector<16x256xf32>
    %50 = arith.mulf %48, %49 : vector<16x256xf32>
    %51 = arith.addf %46, %50 : vector<16x256xf32>
    %52 = vector.extract_strided_slice %2 {offsets = [0, 3], sizes = [16, 1], strides = [1, 1]} : vector<16x9xf32> to vector<16x1xf32>
    %53 = vector.broadcast %52 : vector<16x1xf32> to vector<16x256xf32>
    %54 = vector.broadcast %27 : vector<1x256xf32> to vector<16x256xf32>
    %55 = arith.mulf %53, %54 : vector<16x256xf32>
    %56 = arith.addf %51, %55 : vector<16x256xf32>
    %57 = vector.extract_strided_slice %2 {offsets = [0, 4], sizes = [16, 1], strides = [1, 1]} : vector<16x9xf32> to vector<16x1xf32>
    %58 = vector.broadcast %57 : vector<16x1xf32> to vector<16x256xf32>
    %59 = vector.broadcast %1 : vector<1x256xf32> to vector<16x256xf32>
    %60 = arith.mulf %58, %59 : vector<16x256xf32>
    %61 = arith.addf %56, %60 : vector<16x256xf32>
    %62 = vector.extract_strided_slice %2 {offsets = [0, 5], sizes = [16, 1], strides = [1, 1]} : vector<16x9xf32> to vector<16x1xf32>
    %63 = vector.broadcast %62 : vector<16x1xf32> to vector<16x256xf32>
    %64 = vector.broadcast %28 : vector<1x256xf32> to vector<16x256xf32>
    %65 = arith.mulf %63, %64 : vector<16x256xf32>
    %66 = arith.addf %61, %65 : vector<16x256xf32>
    %67 = vector.extract_strided_slice %2 {offsets = [0, 6], sizes = [16, 1], strides = [1, 1]} : vector<16x9xf32> to vector<16x1xf32>
    %68 = vector.broadcast %67 : vector<16x1xf32> to vector<16x256xf32>
    %69 = vector.broadcast %34 : vector<1x256xf32> to vector<16x256xf32>
    %70 = arith.mulf %68, %69 : vector<16x256xf32>
    %71 = arith.addf %66, %70 : vector<16x256xf32>
    %72 = vector.extract_strided_slice %2 {offsets = [0, 7], sizes = [16, 1], strides = [1, 1]} : vector<16x9xf32> to vector<16x1xf32>
    %73 = vector.broadcast %72 : vector<16x1xf32> to vector<16x256xf32>
    %74 = vector.broadcast %35 : vector<1x256xf32> to vector<16x256xf32>
    %75 = arith.mulf %73, %74 : vector<16x256xf32>
    %76 = arith.addf %71, %75 : vector<16x256xf32>
    %77 = vector.extract_strided_slice %2 {offsets = [0, 8], sizes = [16, 1], strides = [1, 1]} : vector<16x9xf32> to vector<16x1xf32>
    %78 = vector.broadcast %77 : vector<16x1xf32> to vector<16x256xf32>
    %79 = vector.broadcast %36 : vector<1x256xf32> to vector<16x256xf32>
    %80 = arith.mulf %78, %79 : vector<16x256xf32>
    %81 = arith.addf %76, %80 : vector<16x256xf32>
    %c0_9 = arith.constant 0 : index
    %c0_10 = arith.constant 0 : index
    %82 = vector.load %arg3[%c0_9, %c0_10] : memref<32x4xf32, #tpu.memory_space<vmem>>, vector<16x1xf32>
    %83 = vector.broadcast %82 : vector<16x1xf32> to vector<16x256xf32>
    %84 = arith.addf %81, %83 : vector<16x256xf32>
    %cst_11 = arith.constant 0.000000e+00 : f32
    %85 = vector.broadcast %cst_11 : f32 to vector<16x256xf32>
    %86 = arith.maximumf %84, %85 : vector<16x256xf32>
    %c16 = arith.constant 16 : index
    %c0_12 = arith.constant 0 : index
    %87 = vector.load %arg2[%c16, %c0_12] : memref<72x288xf32, #tpu.memory_space<vmem>>, vector<32x144xf32>
    %c0_13 = arith.constant 0 : index
    %c1 = arith.constant 1 : index
    %88 = vector.load %arg3[%c0_13, %c1] : memref<32x4xf32, #tpu.memory_space<vmem>>, vector<32x1xf32>
    %89 = tpu.iota {dimensions = array<i32: 1>} : vector<16x256xi32>
    %c255_i32_14 = arith.constant 255 : i32
    %90 = vector.broadcast %c255_i32_14 : i32 to vector<16x256xi32>
    %91 = arith.andi %89, %90 : vector<16x256xi32>
    %c15_i32_15 = arith.constant 15 : i32
    %92 = vector.broadcast %c15_i32_15 : i32 to vector<16x256xi32>
    %93 = arith.andi %89, %92 : vector<16x256xi32>
    %c0_i32_16 = arith.constant 0 : i32
    %94 = vector.broadcast %c0_i32_16 : i32 to vector<16x256xi32>
    %95 = arith.cmpi eq, %93, %94 : vector<16x256xi32>
    %c15_i32_17 = arith.constant 15 : i32
    %96 = vector.broadcast %c15_i32_17 : i32 to vector<16x256xi32>
    %97 = arith.cmpi eq, %93, %96 : vector<16x256xi32>
    %c16_i32_18 = arith.constant 16 : i32
    %98 = vector.broadcast %c16_i32_18 : i32 to vector<16x256xi32>
    %99 = arith.cmpi slt, %91, %98 : vector<16x256xi32>
    %c240_i32_19 = arith.constant 240 : i32
    %100 = vector.broadcast %c240_i32_19 : i32 to vector<16x256xi32>
    %101 = arith.cmpi sge, %91, %100 : vector<16x256xi32>
    %c17_i32_20 = arith.constant 17 : i32
    %102 = tpu.dynamic_rotate %86 by %c17_i32_20 dim 1 : vector<16x256xf32>, i32 -> vector<16x256xf32>
    %c16_i32_21 = arith.constant 16 : i32
    %103 = tpu.dynamic_rotate %86 by %c16_i32_21 dim 1 : vector<16x256xf32>, i32 -> vector<16x256xf32>
    %c15_i32_22 = arith.constant 15 : i32
    %104 = tpu.dynamic_rotate %86 by %c15_i32_22 dim 1 : vector<16x256xf32>, i32 -> vector<16x256xf32>
    %c1_i32_23 = arith.constant 1 : i32
    %105 = tpu.dynamic_rotate %86 by %c1_i32_23 dim 1 : vector<16x256xf32>, i32 -> vector<16x256xf32>
    %c255_i32_24 = arith.constant 255 : i32
    %106 = tpu.dynamic_rotate %86 by %c255_i32_24 dim 1 : vector<16x256xf32>, i32 -> vector<16x256xf32>
    %c241_i32_25 = arith.constant 241 : i32
    %107 = tpu.dynamic_rotate %86 by %c241_i32_25 dim 1 : vector<16x256xf32>, i32 -> vector<16x256xf32>
    %c240_i32_26 = arith.constant 240 : i32
    %108 = tpu.dynamic_rotate %86 by %c240_i32_26 dim 1 : vector<16x256xf32>, i32 -> vector<16x256xf32>
    %c239_i32_27 = arith.constant 239 : i32
    %109 = tpu.dynamic_rotate %86 by %c239_i32_27 dim 1 : vector<16x256xf32>, i32 -> vector<16x256xf32>
    %110 = arith.select %95, %104, %102 : vector<16x256xi1>, vector<16x256xf32>
    %111 = arith.select %97, %102, %104 : vector<16x256xi1>, vector<16x256xf32>
    %112 = arith.select %95, %106, %105 : vector<16x256xi1>, vector<16x256xf32>
    %113 = arith.select %97, %105, %106 : vector<16x256xi1>, vector<16x256xf32>
    %114 = arith.select %95, %109, %107 : vector<16x256xi1>, vector<16x256xf32>
    %115 = arith.select %97, %107, %109 : vector<16x256xi1>, vector<16x256xf32>
    %116 = arith.select %99, %114, %110 : vector<16x256xi1>, vector<16x256xf32>
    %117 = arith.select %99, %108, %103 : vector<16x256xi1>, vector<16x256xf32>
    %118 = arith.select %99, %115, %111 : vector<16x256xi1>, vector<16x256xf32>
    %119 = arith.select %101, %110, %114 : vector<16x256xi1>, vector<16x256xf32>
    %120 = arith.select %101, %103, %108 : vector<16x256xi1>, vector<16x256xf32>
    %121 = arith.select %101, %111, %115 : vector<16x256xi1>, vector<16x256xf32>
    %c0_28 = arith.constant 0 : index
    %c0_29 = arith.constant 0 : index
    %122 = vector.load %arg5[%c0_28, %c0_29] : memref<288x256xf32, #tpu.memory_space<vmem>>, vector<16x256xf32>
    tpu.vector_store %arg5[%c0_28, %c0_29], %116 {strides = array<i32>} : memref<288x256xf32, #tpu.memory_space<vmem>>, vector<16x256xf32>,
    %c16_30 = arith.constant 16 : index
    %c0_31 = arith.constant 0 : index
    %123 = vector.load %arg5[%c16_30, %c0_31] : memref<288x256xf32, #tpu.memory_space<vmem>>, vector<16x256xf32>
    tpu.vector_store %arg5[%c16_30, %c0_31], %117 {strides = array<i32>} : memref<288x256xf32, #tpu.memory_space<vmem>>, vector<16x256xf32>,
    %c32 = arith.constant 32 : index
    %c0_32 = arith.constant 0 : index
    %124 = vector.load %arg5[%c32, %c0_32] : memref<288x256xf32, #tpu.memory_space<vmem>>, vector<16x256xf32>
    tpu.vector_store %arg5[%c32, %c0_32], %118 {strides = array<i32>} : memref<288x256xf32, #tpu.memory_space<vmem>>, vector<16x256xf32>,
    %c48 = arith.constant 48 : index
    %c0_33 = arith.constant 0 : index
    %125 = vector.load %arg5[%c48, %c0_33] : memref<288x256xf32, #tpu.memory_space<vmem>>, vector<16x256xf32>
    tpu.vector_store %arg5[%c48, %c0_33], %112 {strides = array<i32>} : memref<288x256xf32, #tpu.memory_space<vmem>>, vector<16x256xf32>,
    %c64 = arith.constant 64 : index
    %c0_34 = arith.constant 0 : index
    %126 = vector.load %arg5[%c64, %c0_34] : memref<288x256xf32, #tpu.memory_space<vmem>>, vector<16x256xf32>
    tpu.vector_store %arg5[%c64, %c0_34], %86 {strides = array<i32>} : memref<288x256xf32, #tpu.memory_space<vmem>>, vector<16x256xf32>,
    %c80 = arith.constant 80 : index
    %c0_35 = arith.constant 0 : index
    %127 = vector.load %arg5[%c80, %c0_35] : memref<288x256xf32, #tpu.memory_space<vmem>>, vector<16x256xf32>
    tpu.vector_store %arg5[%c80, %c0_35], %113 {strides = array<i32>} : memref<288x256xf32, #tpu.memory_space<vmem>>, vector<16x256xf32>,
    %c96 = arith.constant 96 : index
    %c0_36 = arith.constant 0 : index
    %128 = vector.load %arg5[%c96, %c0_36] : memref<288x256xf32, #tpu.memory_space<vmem>>, vector<16x256xf32>
    tpu.vector_store %arg5[%c96, %c0_36], %119 {strides = array<i32>} : memref<288x256xf32, #tpu.memory_space<vmem>>, vector<16x256xf32>,
    %c112 = arith.constant 112 : index
    %c0_37 = arith.constant 0 : index
    %129 = vector.load %arg5[%c112, %c0_37] : memref<288x256xf32, #tpu.memory_space<vmem>>, vector<16x256xf32>
    tpu.vector_store %arg5[%c112, %c0_37], %120 {strides = array<i32>} : memref<288x256xf32, #tpu.memory_space<vmem>>, vector<16x256xf32>,
    %c128 = arith.constant 128 : index
    %c0_38 = arith.constant 0 : index
    %130 = vector.load %arg5[%c128, %c0_38] : memref<288x256xf32, #tpu.memory_space<vmem>>, vector<16x256xf32>
    tpu.vector_store %arg5[%c128, %c0_38], %121 {strides = array<i32>} : memref<288x256xf32, #tpu.memory_space<vmem>>, vector<16x256xf32>,
    %c0_39 = arith.constant 0 : index
    %c0_40 = arith.constant 0 : index
    %131 = vector.load %arg5[%c0_39, %c0_40] : memref<288x256xf32, #tpu.memory_space<vmem>>, vector<144x256xf32>
    %cst_41 = arith.constant dense<0.000000e+00> : vector<32x256xf32>
    %132 = tpu.matmul %87, %131, %cst_41 {dimension_numbers = #tpu.dot_dimension_numbers<[1], [0], [0], [1], [0, 0, 1, 1], [], []>} : vector<32x144xf32>, vector<144x256xf32>, vector<32x256xf32> -> vector<32x256xf32>
    %133 = vector.broadcast %88 : vector<32x1xf32> to vector<32x256xf32>
    %134 = arith.addf %132, %133 : vector<32x256xf32>
    %cst_42 = arith.constant 0.000000e+00 : f32
    %135 = vector.broadcast %cst_42 : f32 to vector<32x256xf32>
    %136 = arith.maximumf %134, %135 : vector<32x256xf32>
    %c48_43 = arith.constant 48 : index
    %c0_44 = arith.constant 0 : index
    %137 = vector.load %arg2[%c48_43, %c0_44] : memref<72x288xf32, #tpu.memory_space<vmem>>, vector<16x288xf32>
    %c0_45 = arith.constant 0 : index
    %c2 = arith.constant 2 : index
    %138 = vector.load %arg3[%c0_45, %c2] : memref<32x4xf32, #tpu.memory_space<vmem>>, vector<16x1xf32>
    %139 = tpu.iota {dimensions = array<i32: 1>} : vector<32x256xi32>
    %c255_i32_46 = arith.constant 255 : i32
    %140 = vector.broadcast %c255_i32_46 : i32 to vector<32x256xi32>
    %141 = arith.andi %139, %140 : vector<32x256xi32>
    %c15_i32_47 = arith.constant 15 : i32
    %142 = vector.broadcast %c15_i32_47 : i32 to vector<32x256xi32>
    %143 = arith.andi %139, %142 : vector<32x256xi32>
    %c0_i32_48 = arith.constant 0 : i32
    %144 = vector.broadcast %c0_i32_48 : i32 to vector<32x256xi32>
    %145 = arith.cmpi eq, %143, %144 : vector<32x256xi32>
    %c15_i32_49 = arith.constant 15 : i32
    %146 = vector.broadcast %c15_i32_49 : i32 to vector<32x256xi32>
    %147 = arith.cmpi eq, %143, %146 : vector<32x256xi32>
    %c16_i32_50 = arith.constant 16 : i32
    %148 = vector.broadcast %c16_i32_50 : i32 to vector<32x256xi32>
    %149 = arith.cmpi slt, %141, %148 : vector<32x256xi32>
    %c240_i32_51 = arith.constant 240 : i32
    %150 = vector.broadcast %c240_i32_51 : i32 to vector<32x256xi32>
    %151 = arith.cmpi sge, %141, %150 : vector<32x256xi32>
    %c17_i32_52 = arith.constant 17 : i32
    %152 = tpu.dynamic_rotate %136 by %c17_i32_52 dim 1 : vector<32x256xf32>, i32 -> vector<32x256xf32>
    %c16_i32_53 = arith.constant 16 : i32
    %153 = tpu.dynamic_rotate %136 by %c16_i32_53 dim 1 : vector<32x256xf32>, i32 -> vector<32x256xf32>
    %c15_i32_54 = arith.constant 15 : i32
    %154 = tpu.dynamic_rotate %136 by %c15_i32_54 dim 1 : vector<32x256xf32>, i32 -> vector<32x256xf32>
    %c1_i32_55 = arith.constant 1 : i32
    %155 = tpu.dynamic_rotate %136 by %c1_i32_55 dim 1 : vector<32x256xf32>, i32 -> vector<32x256xf32>
    %c255_i32_56 = arith.constant 255 : i32
    %156 = tpu.dynamic_rotate %136 by %c255_i32_56 dim 1 : vector<32x256xf32>, i32 -> vector<32x256xf32>
    %c241_i32_57 = arith.constant 241 : i32
    %157 = tpu.dynamic_rotate %136 by %c241_i32_57 dim 1 : vector<32x256xf32>, i32 -> vector<32x256xf32>
    %c240_i32_58 = arith.constant 240 : i32
    %158 = tpu.dynamic_rotate %136 by %c240_i32_58 dim 1 : vector<32x256xf32>, i32 -> vector<32x256xf32>
    %c239_i32_59 = arith.constant 239 : i32
    %159 = tpu.dynamic_rotate %136 by %c239_i32_59 dim 1 : vector<32x256xf32>, i32 -> vector<32x256xf32>
    %160 = arith.select %145, %154, %152 : vector<32x256xi1>, vector<32x256xf32>
    %161 = arith.select %147, %152, %154 : vector<32x256xi1>, vector<32x256xf32>
    %162 = arith.select %145, %156, %155 : vector<32x256xi1>, vector<32x256xf32>
    %163 = arith.select %147, %155, %156 : vector<32x256xi1>, vector<32x256xf32>
    %164 = arith.select %145, %159, %157 : vector<32x256xi1>, vector<32x256xf32>
    %165 = arith.select %147, %157, %159 : vector<32x256xi1>, vector<32x256xf32>
    %166 = arith.select %149, %164, %160 : vector<32x256xi1>, vector<32x256xf32>
    %167 = arith.select %149, %158, %153 : vector<32x256xi1>, vector<32x256xf32>
    %168 = arith.select %149, %165, %161 : vector<32x256xi1>, vector<32x256xf32>
    %169 = arith.select %151, %160, %164 : vector<32x256xi1>, vector<32x256xf32>
    %170 = arith.select %151, %153, %158 : vector<32x256xi1>, vector<32x256xf32>
    %171 = arith.select %151, %161, %165 : vector<32x256xi1>, vector<32x256xf32>
    %c0_60 = arith.constant 0 : index
    %c0_61 = arith.constant 0 : index
    %172 = vector.load %arg5[%c0_60, %c0_61] : memref<288x256xf32, #tpu.memory_space<vmem>>, vector<32x256xf32>
    tpu.vector_store %arg5[%c0_60, %c0_61], %166 {strides = array<i32>} : memref<288x256xf32, #tpu.memory_space<vmem>>, vector<32x256xf32>,
    %c32_62 = arith.constant 32 : index
    %c0_63 = arith.constant 0 : index
    %173 = vector.load %arg5[%c32_62, %c0_63] : memref<288x256xf32, #tpu.memory_space<vmem>>, vector<32x256xf32>
    tpu.vector_store %arg5[%c32_62, %c0_63], %167 {strides = array<i32>} : memref<288x256xf32, #tpu.memory_space<vmem>>, vector<32x256xf32>,
    %c64_64 = arith.constant 64 : index
    %c0_65 = arith.constant 0 : index
    %174 = vector.load %arg5[%c64_64, %c0_65] : memref<288x256xf32, #tpu.memory_space<vmem>>, vector<32x256xf32>
    tpu.vector_store %arg5[%c64_64, %c0_65], %168 {strides = array<i32>} : memref<288x256xf32, #tpu.memory_space<vmem>>, vector<32x256xf32>,
    %c96_66 = arith.constant 96 : index
    %c0_67 = arith.constant 0 : index
    %175 = vector.load %arg5[%c96_66, %c0_67] : memref<288x256xf32, #tpu.memory_space<vmem>>, vector<32x256xf32>
    tpu.vector_store %arg5[%c96_66, %c0_67], %162 {strides = array<i32>} : memref<288x256xf32, #tpu.memory_space<vmem>>, vector<32x256xf32>,
    %c128_68 = arith.constant 128 : index
    %c0_69 = arith.constant 0 : index
    %176 = vector.load %arg5[%c128_68, %c0_69] : memref<288x256xf32, #tpu.memory_space<vmem>>, vector<32x256xf32>
    tpu.vector_store %arg5[%c128_68, %c0_69], %136 {strides = array<i32>} : memref<288x256xf32, #tpu.memory_space<vmem>>, vector<32x256xf32>,
    %c160 = arith.constant 160 : index
    %c0_70 = arith.constant 0 : index
    %177 = vector.load %arg5[%c160, %c0_70] : memref<288x256xf32, #tpu.memory_space<vmem>>, vector<32x256xf32>
    tpu.vector_store %arg5[%c160, %c0_70], %163 {strides = array<i32>} : memref<288x256xf32, #tpu.memory_space<vmem>>, vector<32x256xf32>,
    %c192 = arith.constant 192 : index
    %c0_71 = arith.constant 0 : index
    %178 = vector.load %arg5[%c192, %c0_71] : memref<288x256xf32, #tpu.memory_space<vmem>>, vector<32x256xf32>
    tpu.vector_store %arg5[%c192, %c0_71], %169 {strides = array<i32>} : memref<288x256xf32, #tpu.memory_space<vmem>>, vector<32x256xf32>,
    %c224 = arith.constant 224 : index
    %c0_72 = arith.constant 0 : index
    %179 = vector.load %arg5[%c224, %c0_72] : memref<288x256xf32, #tpu.memory_space<vmem>>, vector<32x256xf32>
    tpu.vector_store %arg5[%c224, %c0_72], %170 {strides = array<i32>} : memref<288x256xf32, #tpu.memory_space<vmem>>, vector<32x256xf32>,
    %c256 = arith.constant 256 : index
    %c0_73 = arith.constant 0 : index
    %180 = vector.load %arg5[%c256, %c0_73] : memref<288x256xf32, #tpu.memory_space<vmem>>, vector<32x256xf32>
    tpu.vector_store %arg5[%c256, %c0_73], %171 {strides = array<i32>} : memref<288x256xf32, #tpu.memory_space<vmem>>, vector<32x256xf32>,
    %c0_74 = arith.constant 0 : index
    %c0_75 = arith.constant 0 : index
    %181 = vector.load %arg5[%c0_74, %c0_75] : memref<288x256xf32, #tpu.memory_space<vmem>>, vector<288x256xf32>
    %cst_76 = arith.constant dense<0.000000e+00> : vector<16x256xf32>
    %182 = tpu.matmul %137, %181, %cst_76 {dimension_numbers = #tpu.dot_dimension_numbers<[1], [0], [0], [1], [0, 0, 1, 1], [], []>} : vector<16x288xf32>, vector<288x256xf32>, vector<16x256xf32> -> vector<16x256xf32>
    %183 = vector.broadcast %138 : vector<16x1xf32> to vector<16x256xf32>
    %184 = arith.addf %182, %183 : vector<16x256xf32>
    %cst_77 = arith.constant 0.000000e+00 : f32
    %185 = vector.broadcast %cst_77 : f32 to vector<16x256xf32>
    %186 = arith.maximumf %184, %185 : vector<16x256xf32>
    %c64_78 = arith.constant 64 : index
    %c0_79 = arith.constant 0 : index
    %187 = vector.load %arg2[%c64_78, %c0_79] : memref<72x288xf32, #tpu.memory_space<vmem>>, vector<1x144xf32>
    %c0_80 = arith.constant 0 : index
    %c3 = arith.constant 3 : index
    %188 = vector.load %arg3[%c0_80, %c3] : memref<32x4xf32, #tpu.memory_space<vmem>>, vector<1x1xf32>
    %189 = tpu.iota {dimensions = array<i32: 1>} : vector<16x256xi32>
    %c255_i32_81 = arith.constant 255 : i32
    %190 = vector.broadcast %c255_i32_81 : i32 to vector<16x256xi32>
    %191 = arith.andi %189, %190 : vector<16x256xi32>
    %c15_i32_82 = arith.constant 15 : i32
    %192 = vector.broadcast %c15_i32_82 : i32 to vector<16x256xi32>
    %193 = arith.andi %189, %192 : vector<16x256xi32>
    %c0_i32_83 = arith.constant 0 : i32
    %194 = vector.broadcast %c0_i32_83 : i32 to vector<16x256xi32>
    %195 = arith.cmpi eq, %193, %194 : vector<16x256xi32>
    %c15_i32_84 = arith.constant 15 : i32
    %196 = vector.broadcast %c15_i32_84 : i32 to vector<16x256xi32>
    %197 = arith.cmpi eq, %193, %196 : vector<16x256xi32>
    %c16_i32_85 = arith.constant 16 : i32
    %198 = vector.broadcast %c16_i32_85 : i32 to vector<16x256xi32>
    %199 = arith.cmpi slt, %191, %198 : vector<16x256xi32>
    %c240_i32_86 = arith.constant 240 : i32
    %200 = vector.broadcast %c240_i32_86 : i32 to vector<16x256xi32>
    %201 = arith.cmpi sge, %191, %200 : vector<16x256xi32>
    %c17_i32_87 = arith.constant 17 : i32
    %202 = tpu.dynamic_rotate %186 by %c17_i32_87 dim 1 : vector<16x256xf32>, i32 -> vector<16x256xf32>
    %c16_i32_88 = arith.constant 16 : i32
    %203 = tpu.dynamic_rotate %186 by %c16_i32_88 dim 1 : vector<16x256xf32>, i32 -> vector<16x256xf32>
    %c15_i32_89 = arith.constant 15 : i32
    %204 = tpu.dynamic_rotate %186 by %c15_i32_89 dim 1 : vector<16x256xf32>, i32 -> vector<16x256xf32>
    %c1_i32_90 = arith.constant 1 : i32
    %205 = tpu.dynamic_rotate %186 by %c1_i32_90 dim 1 : vector<16x256xf32>, i32 -> vector<16x256xf32>
    %c255_i32_91 = arith.constant 255 : i32
    %206 = tpu.dynamic_rotate %186 by %c255_i32_91 dim 1 : vector<16x256xf32>, i32 -> vector<16x256xf32>
    %c241_i32_92 = arith.constant 241 : i32
    %207 = tpu.dynamic_rotate %186 by %c241_i32_92 dim 1 : vector<16x256xf32>, i32 -> vector<16x256xf32>
    %c240_i32_93 = arith.constant 240 : i32
    %208 = tpu.dynamic_rotate %186 by %c240_i32_93 dim 1 : vector<16x256xf32>, i32 -> vector<16x256xf32>
    %c239_i32_94 = arith.constant 239 : i32
    %209 = tpu.dynamic_rotate %186 by %c239_i32_94 dim 1 : vector<16x256xf32>, i32 -> vector<16x256xf32>
    %210 = arith.select %195, %204, %202 : vector<16x256xi1>, vector<16x256xf32>
    %211 = arith.select %197, %202, %204 : vector<16x256xi1>, vector<16x256xf32>
    %212 = arith.select %195, %206, %205 : vector<16x256xi1>, vector<16x256xf32>
    %213 = arith.select %197, %205, %206 : vector<16x256xi1>, vector<16x256xf32>
    %214 = arith.select %195, %209, %207 : vector<16x256xi1>, vector<16x256xf32>
    %215 = arith.select %197, %207, %209 : vector<16x256xi1>, vector<16x256xf32>
    %216 = arith.select %199, %214, %210 : vector<16x256xi1>, vector<16x256xf32>
    %217 = arith.select %199, %208, %203 : vector<16x256xi1>, vector<16x256xf32>
    %218 = arith.select %199, %215, %211 : vector<16x256xi1>, vector<16x256xf32>
    %219 = arith.select %201, %210, %214 : vector<16x256xi1>, vector<16x256xf32>
    %220 = arith.select %201, %203, %208 : vector<16x256xi1>, vector<16x256xf32>
    %221 = arith.select %201, %211, %215 : vector<16x256xi1>, vector<16x256xf32>
    %c0_95 = arith.constant 0 : index
    %c0_96 = arith.constant 0 : index
    %222 = vector.load %arg5[%c0_95, %c0_96] : memref<288x256xf32, #tpu.memory_space<vmem>>, vector<16x256xf32>
    tpu.vector_store %arg5[%c0_95, %c0_96], %216 {strides = array<i32>} : memref<288x256xf32, #tpu.memory_space<vmem>>, vector<16x256xf32>,
    %c16_97 = arith.constant 16 : index
    %c0_98 = arith.constant 0 : index
    %223 = vector.load %arg5[%c16_97, %c0_98] : memref<288x256xf32, #tpu.memory_space<vmem>>, vector<16x256xf32>
    tpu.vector_store %arg5[%c16_97, %c0_98], %217 {strides = array<i32>} : memref<288x256xf32, #tpu.memory_space<vmem>>, vector<16x256xf32>,
    %c32_99 = arith.constant 32 : index
    %c0_100 = arith.constant 0 : index
    %224 = vector.load %arg5[%c32_99, %c0_100] : memref<288x256xf32, #tpu.memory_space<vmem>>, vector<16x256xf32>
    tpu.vector_store %arg5[%c32_99, %c0_100], %218 {strides = array<i32>} : memref<288x256xf32, #tpu.memory_space<vmem>>, vector<16x256xf32>,
    %c48_101 = arith.constant 48 : index
    %c0_102 = arith.constant 0 : index
    %225 = vector.load %arg5[%c48_101, %c0_102] : memref<288x256xf32, #tpu.memory_space<vmem>>, vector<16x256xf32>
    tpu.vector_store %arg5[%c48_101, %c0_102], %212 {strides = array<i32>} : memref<288x256xf32, #tpu.memory_space<vmem>>, vector<16x256xf32>,
    %c64_103 = arith.constant 64 : index
    %c0_104 = arith.constant 0 : index
    %226 = vector.load %arg5[%c64_103, %c0_104] : memref<288x256xf32, #tpu.memory_space<vmem>>, vector<16x256xf32>
    tpu.vector_store %arg5[%c64_103, %c0_104], %186 {strides = array<i32>} : memref<288x256xf32, #tpu.memory_space<vmem>>, vector<16x256xf32>,
    %c80_105 = arith.constant 80 : index
    %c0_106 = arith.constant 0 : index
    %227 = vector.load %arg5[%c80_105, %c0_106] : memref<288x256xf32, #tpu.memory_space<vmem>>, vector<16x256xf32>
    tpu.vector_store %arg5[%c80_105, %c0_106], %213 {strides = array<i32>} : memref<288x256xf32, #tpu.memory_space<vmem>>, vector<16x256xf32>,
    %c96_107 = arith.constant 96 : index
    %c0_108 = arith.constant 0 : index
    %228 = vector.load %arg5[%c96_107, %c0_108] : memref<288x256xf32, #tpu.memory_space<vmem>>, vector<16x256xf32>
    tpu.vector_store %arg5[%c96_107, %c0_108], %219 {strides = array<i32>} : memref<288x256xf32, #tpu.memory_space<vmem>>, vector<16x256xf32>,
    %c112_109 = arith.constant 112 : index
    %c0_110 = arith.constant 0 : index
    %229 = vector.load %arg5[%c112_109, %c0_110] : memref<288x256xf32, #tpu.memory_space<vmem>>, vector<16x256xf32>
    tpu.vector_store %arg5[%c112_109, %c0_110], %220 {strides = array<i32>} : memref<288x256xf32, #tpu.memory_space<vmem>>, vector<16x256xf32>,
    %c128_111 = arith.constant 128 : index
    %c0_112 = arith.constant 0 : index
    %230 = vector.load %arg5[%c128_111, %c0_112] : memref<288x256xf32, #tpu.memory_space<vmem>>, vector<16x256xf32>
    tpu.vector_store %arg5[%c128_111, %c0_112], %221 {strides = array<i32>} : memref<288x256xf32, #tpu.memory_space<vmem>>, vector<16x256xf32>,
    %c0_113 = arith.constant 0 : index
    %c0_114 = arith.constant 0 : index
    %231 = vector.load %arg5[%c0_113, %c0_114] : memref<288x256xf32, #tpu.memory_space<vmem>>, vector<144x256xf32>
    %cst_115 = arith.constant dense<0.000000e+00> : vector<1x256xf32>
    %232 = tpu.matmul %187, %231, %cst_115 {dimension_numbers = #tpu.dot_dimension_numbers<[1], [0], [0], [1], [0, 0, 1, 1], [], []>} : vector<1x144xf32>, vector<144x256xf32>, vector<1x256xf32> -> vector<1x256xf32>
    %233 = vector.broadcast %188 : vector<1x1xf32> to vector<1x256xf32>
    %234 = arith.addf %232, %233 : vector<1x256xf32>
    %235 = math.tanh %234 : vector<1x256xf32>
    %cst_116 = arith.constant 5.000000e-01 : f32
    %236 = vector.broadcast %cst_116 : f32 to vector<1x256xf32>
    %237 = arith.mulf %235, %236 : vector<1x256xf32>
    %cst_117 = arith.constant 5.000000e-01 : f32
    %238 = vector.broadcast %cst_117 : f32 to vector<1x256xf32>
    %239 = arith.addf %237, %238 : vector<1x256xf32>
    %c0_118 = arith.constant 0 : index
    %c0_119 = arith.constant 0 : index
    %c0_120 = arith.constant 0 : index
    %240 = vector.load %arg4[%c0_118, %c0_119, %c0_120] : memref<1x1x256xf32, #tpu.memory_space<vmem>>, vector<1x1x256xf32>
    %241 = vector.shape_cast %240 : vector<1x1x256xf32> to vector<1x256xf32>
    %242 = vector.shape_cast %239 : vector<1x256xf32> to vector<1x1x256xf32>
    tpu.vector_store %arg4[%c0_118, %c0_119, %c0_120], %242 {strides = array<i32>} : memref<1x1x256xf32, #tpu.memory_space<vmem>>, vector<1x1x256xf32>,
    return
  }
  func.func @transform_0(%arg0: i32) -> (i32, i32, i32) {
    %c0_i32 = arith.constant 0 : i32
    %c0_i32_0 = arith.constant 0 : i32
    %c0_i32_1 = arith.constant 0 : i32
    return %arg0, %c0_i32, %c0_i32_0 : i32, i32, i32
  }
  func.func @transform_1(%arg0: i32) -> (i32, i32) {
    %c0_i32 = arith.constant 0 : i32
    %c0_i32_0 = arith.constant 0 : i32
    %c0_i32_1 = arith.constant 0 : i32
    return %c0_i32, %c0_i32_0 : i32, i32
  }
  func.func @transform_2(%arg0: i32) -> (i32, i32) {
    %c0_i32 = arith.constant 0 : i32
    %c0_i32_0 = arith.constant 0 : i32
    %c0_i32_1 = arith.constant 0 : i32
    return %c0_i32, %c0_i32_0 : i32, i32
  }
  func.func @transform_3(%arg0: i32) -> (i32, i32, i32) {
    %c0_i32 = arith.constant 0 : i32
    %c0_i32_0 = arith.constant 0 : i32
    %c0_i32_1 = arith.constant 0 : i32
    return %arg0, %c0_i32, %c0_i32_0 : i32, i32, i32
  }
}

</mosaic_0001>

<bundles_post_ra>
// kernel: forward.1
= control target key start
LH: loop header
LB: loop body
LE: loop exit
PB: predicated region body
PF: predicated region fallthrough
CT: control target
= control target key end

     0   :  { %8 = vsyncpa [#allocation4], 0  ;;  %s2531_s12 = smov 0   ;;  %s4085_s0 = inlined_call_operand.vmem [shape: f32[2,1,256], index: 0, kind: input, shape index: {}]   ;;  %s4086_s1 = inlined_call_operand.hbm [shape: f32[72,288], index: 1, kind: input, shape index: {}]   ;;  %s4087_s2 = inlined_call_operand.vmem [shape: f32[32,4], index: 2, kind: input, shape index: {}]   ;;  %s4088_s3 = inlined_call_operand.vmem [shape: f32[2,1,256], index: 3, kind: output, shape index: {}]  }
   0x1 LB: > { %s2537_s13 = sadd.s32 4294967295, %s2487_s12   ;;  %p1896_p0 = scmp.ge.s32.totalorder %s2487_s12, 1  ;;  %s2487_s12 = sphi %s2531_s12, %s14_s12  }
   0x2   : > { %p113_p1 = scmp.lt.s32.totalorder %s2487_s12, 3  ;;  %s2489_s14 = smov [#allocation3]  }
   0x3   : > { %s125_s15 = sshll.u32 %s2489_s14, 4  ;;  %p4089_p3 = scmp.eq.s32.totalorder %s2537_s13, 0  ;;  %s126_s15 = int_to_ptr.vmem [resolvable:$true] %s125_s15 }
   0x4   : > { %p2541_p2 = pnand %p1896_p0, %p113_p1  ;;  %s2449_s20 = scalar_lea.hbm %s4086_s1, 3456 }
   0x5   : > { %p2450_p6 = scmp.ne.s32.totalorder %s4086_s1, %s2449_s20  ;;  %p2456_p10 = scmp.lt.u32.totalorder %s2449_s20, %s4086_s1 }
   0x6   : > { %s4115_s16 = scalar_select %p2541_p2, 1, 0 }
   0x7   : > { %p2068_p4 = pneg %p2541_p2 }
   0x9   : > { %p2550_p5 = pnand %p4089_p3, %p2068_p4 }
   0xb   : > { %p2451_p7 = pneg %p2550_p5 }
   0xd   : > { %p2452_p8 = pnand %p2451_p7, %p2450_p6 }
   0xf   : > { %p2453_p9 = pneg %p2452_p8 }
  0x11   : > { %p2458_p11 = pnand %p2456_p10, %p2453_p9 }
  0x13   : > { %2461 = shalt.err (!%p2458_p11)
}
  0x14   : > { %s2462_s25 = scalar_lea.vmem %s126_s15, 3456  ;;  %p2470_p1 = scmp.lt.s32.totalorder %s126_s15, %s126_s15 }
  0x15   : > { %p2463_p12 = scmp.ne.s32.totalorder %s126_s15, %s2462_s25  ;;  %p2471_p4 = scmp.lt.s32.totalorder %s2462_s25, %s2462_s25 }
  0x17   : > { %p2465_p13 = pnand %p2463_p12, %p2451_p7  ;;  %p2472_p3 = por %p2471_p4, %p2470_p1 }
  0x19   : > { %p2466_p0 = pneg %p2465_p13 }
  0x1b   : > { %p2473_p2 = pnand %p2472_p3, %p2466_p0 }
  0x1d   : > { %2476 = shalt.err (!%p2473_p2)
}
  0x1e   : > { %s2490_s26 = smov 384   ;;  %s2491_s27 = smov 24  }
  0x1f   : > { %2071 = dma.hbm_to_vmem [thread:$0]  (!%p2550_p5), %s4086_s1, 3456, %s126_s15, [#allocation4], %s2490_s26, %s2490_s26, %s2491_s27  }
  0x20   : > { %p4117_p6 = scmp.ne.s32.totalorder %s4115_s16, 0 }
  0x22   : > { %151 = sbr.rel (%p4117_p6) target bundleno = 1522 (0x5f2), region = 32 }
  0x29   : > { %p4118_p8 = scmp.eq.s32.totalorder %s2537_s13, 0 }
  0x2b   : > { %2482 = dma.done.wait (%p4118_p8), [#allocation4], 3456   ;;  %p4119_p7 = pmov %p4118_p8 }
  0x2c   : > { %p173_p2 = scmp.lt.s32.totalorder %s2537_s13, 1  ;;  %v4091_v0 = vlaneseq  ;;  %v2492_v1 = vmov 1   ;;  %v2493_v2 = vmov 0   ;;  %v2591_v4 = vld [vmem:[#allocation3] sm:$0xff]  ;;  %v2599_v7 = vld [vmem:[#allocation3 + $0x18] sm:$0xff]  ;;  %s2494_s7 = smov 17  }
  0x2d   : > { %2484 = vsyncadd (%p4119_p7), [#allocation4], 4294963840  ;;  %2105 = vset.pattern.permute.xlu1 %v2492_v1  ;;  %2104 = vset.pattern.permute.xlu0 %v2493_v2  ;;  %v2495_v11 = vmov 2   ;;  %s2496_s8 = smov 15   ;;  %s2497_s9 = smov 113   ;;  %v2500_v12 = vmov 3  }
  0x2e   : > { %s4183_s13 = smov (!%p173_p2, %s2537_s13), 1  ;;  %v2584_v3 = vshrl.u32 %v4091_v0, 7  ;;  %317 = vperm.xlu1 %2105, %v2591_v4   ;;  %292 = vperm.xlu0 %2104, %v2591_v4   ;;  %s2498_s10 = smov 111   ;;  %v2502_v13 = vmov 4   ;;  %v2504_v14 = vmov 5   ;;  %v2506_v15 = vmov 6  }
  0x2f   : > { %s1901_s30 = sshll.u32 %s4183_s13, 1  ;;  %s2499_s11 = smov 16   ;;  %v2507_v16 = vmov 8   ;;  %v2659_v17 = vld [vmem:[%s4087_s2 + $0x8] sm:$0xff]  ;;  %v2508_v18 = vmov 7   ;;  %v2671_v19 = vld [vmem:[%s4087_s2] sm:$0xff] }
  0x30   : > { %4120 = vst [vmem:[#allocation6_spill] sm:$0xff] %v2584_v3  ;;  %s176_s6 = scalar_lea.vmem %s4085_s0, %s1901_s30  ;;  %v2596_v5 = vsub.s32 0, %v2584_v3  ;;  %v4092_v6 = vsub.s32 1, %v2584_v3  ;;  %s2501_s14 = smov 112   ;;  %v2697_v35 = vand.u32 127, %v4091_v0  ;;  %v4126_v53 = vmov 0 }
  0x31   : > { %v181_v8 = vld [vmem:[%s176_s6] sm:$0x3]  ;;  %s2503_s15 = smov 1   ;;  %s2505_s16 = smov 127   ;;  %vm768_vm14 = vcmask 130048   ;;  %vm1328_vm15 = vcmask 261120  }
  0x32   : > { %4121 = vst [vmem:[#allocation7_spill] sm:$0xff] %v2596_v5  ;;  %321 = vperm.xlu1 %2105, %v2599_v7   ;;  %297 = vperm.xlu0 %2104, %v2599_v7   ;;  %v2605_v9 = vrot.slane %v181_v8, %v4092_v6  ;;  %v2608_v10 = vrot.slane %v181_v8, %v2596_v5  ;;  %v2702_v38 = vadd.s32 128, %v2697_v35  ;;  %v189_v41 = vand.u32 15, %v2697_v35 }
  0x33   : > { %vm263_vm0 = vcmp.lt.s32.totalorder %v2697_v35, 111  ;;  %vm228_vm1 = vcmp.lt.s32.totalorder %v2697_v35, 15  ;;  %vm249_vm2 = vcmp.lt.s32.totalorder %v2697_v35, 113  ;;  %v187_v43 = vand.u32 255, %v2697_v35 }
  0x34   : > { %v190_v42 = vand.u32 15, %v2702_v38  ;;  %vm256_vm3 = vcmp.lt.s32.totalorder %v2697_v35, 112  ;;  %vm214_vm4 = vcmp.lt.s32.totalorder %v2697_v35, 17  ;;  %vm2720_vm5 = vcmp.eq.s32.totalorder %v189_v41, 0 }
  0x35   : > { %vm221_vm7 = vcmp.lt.s32.totalorder %v2697_v35, 16  ;;  %vm2747_vm8 = vcmp.lt.s32.totalorder %v187_v43, 16  ;;  %vm2776_vm9 = vcmp.eq.s32.totalorder %v189_v41, 15  ;;  %vm235_vm11 = vcmp.lt.s32.totalorder %v2697_v35, 1 }
  0x36   : > { %212 = vrot.lane.b32.xlu1 %v2605_v9, %s2494_s7  ;;  %210 = vrot.lane.b32.xlu0 %v2608_v10, %s2494_s7  ;;  %vm2724_vm6 = vcmp.eq.s32.totalorder %v190_v42, 0  ;;  %v4127_v53 = vsel %vm2747_vm8, 4294967295, %v4126_v53  ;;  %vm2780_vm10 = vcmp.eq.s32.totalorder %v190_v42, 15  ;;  %vm242_vm12 = vcmp.lt.s32.totalorder %v2697_v35, 127 }
  0x37   : > { %2107 = vset.pattern.permute.xlu1 %v2495_v11  ;;  %2106 = vset.pattern.permute.xlu0 %v2495_v11  ;;  %4128 = vst [vmem:[#allocation8_spill] sm:$0xff] %v4127_v53 }
  0x3a   : > { %226 = vrot.lane.b32.xlu1 %v2605_v9, %s2496_s8  ;;  %224 = vrot.lane.b32.xlu0 %v2608_v10, %s2496_s8 }
  0x3e   : > { %247 = vrot.lane.b32.xlu1 %v2605_v9, %s2497_s9  ;;  %245 = vrot.lane.b32.xlu0 %v2608_v10, %s2497_s9 }
  0x42   : > { %261 = vrot.lane.b32.xlu1 %v2605_v9, %s2498_s10  ;;  %259 = vrot.lane.b32.xlu0 %v2608_v10, %s2498_s10 }
  0x46   : > { %345 = vperm.xlu1 %2107, %v2599_v7   ;;  %341 = vperm.xlu0 %2106, %v2591_v4  }
  0x4a   : > { %217 = vrot.lane.b32.xlu1 %v2608_v10, %s2499_s11  ;;  %219 = vrot.lane.b32.xlu0 %v2605_v9, %s2499_s11 }
  0x4b   : > { %2108 = vset.pattern.permute.xlu1 %v2500_v12  ;;  %2109 = vset.pattern.permute.xlu0 %v2500_v12 }
  0x4e   : > { %252 = vrot.lane.b32.xlu1 %v2608_v10, %s2501_s14  ;;  %254 = vrot.lane.b32.xlu0 %v2605_v9, %s2501_s14 }
  0x52   : > { %365 = vperm.xlu1 %2108, %v2591_v4   ;;  %369 = vperm.xlu0 %2109, %v2599_v7  }
  0x56   : > { %2110 = vset.pattern.permute.xlu1 %v2502_v13  ;;  %231 = vrot.lane.b32.xlu0 %v2608_v10, %s2503_s15 }
  0x57   : > { %389 = vperm.xlu1 %2110, %v2591_v4   ;;  %2111 = vset.pattern.permute.xlu0 %v2504_v14 }
  0x5a   : > { %238 = vrot.lane.b32.xlu0 %v2608_v10, %s2505_s16 }
  0x5b   : > { %393 = vperm.xlu1 %2110, %v2599_v7  }
  0x5e   : > { %405 = vperm.xlu0 %2111, %v2591_v4  }
  0x5f   : > { %233 = vrot.lane.b32.xlu1 %v2605_v9, %s2503_s15 }
  0x60   : > { %2112 = vset.pattern.permute.xlu1 %v2504_v14 }
  0x62   : > { %2114 = vset.pattern.permute.xlu0 %v2506_v15 }
  0x63   : > { %240 = vrot.lane.b32.xlu1 %v2605_v9, %s2505_s16  ;;  %433 = vperm.xlu0 %2114, %v2599_v7  }
  0x67   : > { %409 = vperm.xlu1 %2112, %v2599_v7   ;;  %2116 = vset.pattern.permute.xlu0 %v2507_v16 }
  0x68   : > { %477 = vperm.xlu0 %2116, %v2591_v4  }
  0x6b   : > { %2113 = vset.pattern.permute.xlu1 %v2506_v15 }
  0x6c   : > { %429 = vperm.xlu1 %2113, %v2591_v4   ;;  %2119 = vset.pattern.permute.xlu0 %v2493_v2 }
  0x6d   : > { %509 = vperm.xlu0 %2119, %v2659_v17  }
  0x70   : > { %2115 = vset.pattern.permute.xlu1 %v2508_v18 }
  0x71   : > { %453 = vperm.xlu1 %2115, %v2591_v4   ;;  %2200 = vset.pattern.permute.xlu0 %v2492_v1 }
  0x75   : > { %457 = vperm.xlu1 %2115, %v2599_v7  }
  0x79   : > { %2117 = vset.pattern.permute.xlu1 %v2507_v16 }
  0x7a   : > { %481 = vperm.xlu1 %2117, %v2599_v7  }
  0x7e   : > { %2118 = vset.pattern.permute.xlu1 %v2493_v2 }
  0x7f   : > { %504 = vperm.xlu1 %2118, %v2671_v19  }
  0x83   : > { %2201 = vset.pattern.permute.xlu1 %v2492_v1 }
  0xad   : > { %v2676_v20 = vpop.permute.xlu1 %317  ;;  %v2678_v21 = vpop.permute.xlu0 %292 }
  0xb1   : > { %v2680_v22 = vpop.permute.xlu1 %321  ;;  %v2682_v23 = vpop.permute.xlu0 %297 }
  0xb5   : > { %v213_v24 = vpop.permute.xlu1 %212  ;;  %v211_v25 = vpop.permute.xlu0 %210 }
  0xb6   : > { %v215_v55 = vsel %vm214_vm4, %v211_v25, %v213_v24  ;;  %v216_v56 = vsel %vm214_vm4, %v213_v24, %v211_v25 }
  0xb9   : > { %v227_v26 = vpop.permute.xlu1 %226  ;;  %v225_v27 = vpop.permute.xlu0 %224 }
  0xba   : > { %v229_v49 = vsel %vm228_vm1, %v225_v27, %v227_v26  ;;  %v230_v50 = vsel %vm228_vm1, %v227_v26, %v225_v27 }
  0xbb   : > { %v266_v58 = vsel %vm2720_vm5, %v230_v50, %v216_v56  ;;  %v2765_v59 = vsel %vm2724_vm6, %v229_v49, %v215_v55  ;;  %v268_v15 = vsel %vm2776_vm9, %v216_v56, %v230_v50  ;;  %v2800_v16 = vsel %vm2780_vm10, %v215_v55, %v229_v49 }
  0xbc   : > { %v307_v8 = vrot.slane %v2765_v59, %v2596_v5  ;;  %v355_v27 = vrot.slane %v2800_v16, %v2596_v5 }
  0xbd   : > { %v2684_v28 = vpop.permute.xlu1 %247  ;;  %v2686_v29 = vpop.permute.xlu0 %245 }
  0xbe   : > { %v250_v51 = vsel %vm249_vm2, %v2686_v29, %v2684_v28  ;;  %v309_v26 = vmul.f32 %v307_v8, %v2678_v21 }
  0xc1   : > { %v2688_v30 = vpop.permute.xlu1 %261  ;;  %v2690_v31 = vpop.permute.xlu0 %259 }
  0xc2   : > { %v264_v44 = vsel %vm263_vm0, %v2690_v31, %v2688_v30 }
  0xc3   : > { %v2753_v54 = vsel %vm2720_vm5, %v264_v44, %v250_v51  ;;  %v2789_v4 = vsel %vm2776_vm9, %v250_v51, %v264_v44 }
  0xc4   : > { %v278_v2 = vsel %vm2747_vm8, %v2753_v54, %v266_v58  ;;  %v282_v25 = vsel %vm2747_vm8, %v2789_v4, %v268_v15 }
  0xc5   : > { %v2692_v32 = vpop.permute.xlu1 %345  ;;  %v2694_v33 = vpop.permute.xlu0 %341  ;;  %v303_v18 = vrot.slane %v278_v2, %v2596_v5  ;;  %v351_v42 = vrot.slane %v282_v25, %v2596_v5 }
  0xc6   : > { %v357_v25 = vmul.f32 %v355_v27, %v2694_v33 }
  0xc7   : > { %v308_v41 = vmul.f32 %v303_v18, %v2678_v21  ;;  %v311_v21 = vmul.f32 %v307_v8, %v2682_v23 }
  0xc9   : > { %v218_v34 = vpop.permute.xlu1 %217  ;;  %v220_v36 = vpop.permute.xlu0 %219 }
  0xca   : > { %v223_v57 = vsel %vm221_vm7, %v220_v36, %v218_v34  ;;  %v2769_v60 = vsel %vm221_vm7, %v218_v34, %v220_v36 }
  0xcb   : > { %v331_v13 = vrot.slane %v2769_v60, %v2596_v5 }
  0xcd   : > { %v2699_v37 = vpop.permute.xlu1 %252  ;;  %v2704_v39 = vpop.permute.xlu0 %254  ;;  %v333_v34 = vmul.f32 %v331_v13, %v2676_v20  ;;  %v335_v43 = vmul.f32 %v331_v13, %v2680_v22 }
  0xce   : > { %v2745_v52 = vsel %vm256_vm3, %v2699_v37, %v2704_v39 }
  0xcf   : > { %v280_v61 = vsel %vm2747_vm8, %v2745_v52, %v223_v57  ;;  %v310_v57 = vmul.f32 %v303_v18, %v2682_v23  ;;  %v339_v8 = vadd.f32 %v335_v43, %v311_v21  ;;  %v188_v23 = vand.u32 255, %v2702_v38 }
  0xd0   : > { %v327_v14 = vrot.slane %v280_v61, %v2596_v5  ;;  %v337_v61 = vadd.f32 %v333_v34, %v309_v26 }
  0xd1   : > { %v2706_v40 = vpop.permute.xlu1 %365  ;;  %v2729_v47 = vpop.permute.xlu0 %369  ;;  %vm2856_vm13 = vcmp.ge.s32.totalorder %v188_v23, 240 }
  0xd2   : > { %v332_v36 = vmul.f32 %v327_v14, %v2676_v20  ;;  %v334_v44 = vmul.f32 %v327_v14, %v2680_v22  ;;  %v265_v14 = vsel %vm263_vm0, %v2688_v30, %v2690_v31  ;;  %v251_v31 = vsel %vm249_vm2, %v2684_v28, %v2686_v29 }
  0xd3   : > { %v361_v38 = vadd.f32 %v357_v25, %v337_v61 }
  0xd4   : > { %v336_v2 = vadd.f32 %v332_v36, %v308_v41  ;;  %v338_v15 = vadd.f32 %v334_v44, %v310_v57  ;;  %v358_v36 = vmul.f32 %v351_v42, %v2692_v32  ;;  %v359_v41 = vmul.f32 %v355_v27, %v2692_v32 }
  0xd5   : > { %v232_v7 = vpop.permute.xlu0 %231  ;;  %v275_v32 = vsel %vm2724_vm6, %v265_v14, %v251_v31 }
  0xd6   : > { %v2731_v48 = vpop.permute.xlu1 %389 }
  0xd9   : > { %v239_v49 = vpop.permute.xlu0 %238 }
  0xda   : > { %v2774_v62 = vpop.permute.xlu1 %393 }
  0xdb   : > { %v399_v61 = vmul.f32 %v2774_v62, %v2605_v9 }
  0xdd   : > { %v406_v27 = vpop.permute.xlu0 %405 }
  0xde   : > { %v234_v24 = vpop.permute.xlu1 %233 }
  0xdf   : > { %v236_v51 = vsel %vm235_vm11, %v232_v7, %v234_v24  ;;  %v237_v55 = vsel %vm235_vm11, %v234_v24, %v232_v7  ;;  %v356_v24 = vmul.f32 %v351_v42, %v2694_v33  ;;  %v363_v33 = vadd.f32 %v359_v41, %v339_v8 }
  0xe0   : > { %v362_v42 = vadd.f32 %v358_v36, %v338_v15 }
  0xe1   : > { %v360_v43 = vadd.f32 %v356_v24, %v336_v2  ;;  %v463_v24 = vrot.slane %v2745_v52, %v2596_v5 }
  0xe2   : > { %v241_v50 = vpop.permute.xlu1 %240 }
  0xe3   : > { %v243_v56 = vsel %vm242_vm12, %v239_v49, %v241_v50  ;;  %v244_v20 = vsel %vm242_vm12, %v241_v50, %v239_v49 }
  0xe4   : > { %v270_v22 = vsel %vm2720_vm5, %v243_v56, %v237_v55  ;;  %v271_v58 = vsel %vm2724_vm6, %v244_v20, %v236_v51  ;;  %v272_v44 = vsel %vm2776_vm9, %v237_v55, %v243_v56  ;;  %v258_v55 = vsel %vm256_vm3, %v2704_v39, %v2699_v37 }
  0xe5   : > { %v375_v7 = vrot.slane %v270_v22, %v2596_v5  ;;  %v379_v13 = vrot.slane %v271_v58, %v2596_v5  ;;  %v415_v57 = vrot.slane %v272_v44, %v2596_v5  ;;  %v398_v58 = vmul.f32 %v2774_v62, %v2608_v10  ;;  %v434_v62 = vpop.permute.xlu0 %433 }
  0xe6   : > { %v410_v18 = vpop.permute.xlu1 %409  ;;  %v285_v37 = vsel %vm2856_vm13, %v2765_v59, %v275_v32  ;;  %v287_v39 = vsel %vm2856_vm13, %v2769_v60, %v258_v55 }
  0xe7   : > { %v380_v26 = vmul.f32 %v375_v7, %v2706_v40  ;;  %v381_v34 = vmul.f32 %v379_v13, %v2706_v40  ;;  %v382_v49 = vmul.f32 %v375_v7, %v2729_v47  ;;  %v383_v30 = vmul.f32 %v379_v13, %v2729_v47 }
  0xe8   : > { %v273_v40 = vsel %vm2780_vm10, %v236_v51, %v244_v20  ;;  %v396_v51 = vmul.f32 %v2731_v48, %v2608_v10  ;;  %v397_v20 = vmul.f32 %v2731_v48, %v2605_v9  ;;  %v277_v7 = vsel %vm2780_vm10, %v251_v31, %v265_v14 }
  0xe9   : > { %v384_v50 = vadd.f32 %v380_v26, %v360_v43  ;;  %v385_v28 = vadd.f32 %v381_v34, %v361_v38  ;;  %v386_v56 = vadd.f32 %v382_v49, %v362_v42  ;;  %v387_v21 = vadd.f32 %v383_v30, %v363_v33 }
  0xea   : > { %v419_v22 = vrot.slane %v273_v40, %v2596_v5  ;;  %v439_v10 = vrot.slane %v2753_v54, %v2596_v5  ;;  %v443_v9 = vrot.slane %v285_v37, %v2596_v5  ;;  %v420_v15 = vmul.f32 %v415_v57, %v406_v27 }
  0xeb   : > { %v430_v29 = vpop.permute.xlu1 %429  ;;  %v400_v2 = vadd.f32 %v396_v51, %v384_v50  ;;  %v401_v48 = vadd.f32 %v397_v20, %v385_v28  ;;  %v402_v13 = vadd.f32 %v398_v58, %v386_v56  ;;  %v403_v8 = vadd.f32 %v399_v61, %v387_v21 }
  0xec   : > { %v421_v59 = vmul.f32 %v419_v22, %v406_v27  ;;  %v422_v60 = vmul.f32 %v415_v57, %v410_v18  ;;  %v423_v25 = vmul.f32 %v419_v22, %v410_v18  ;;  %v467_v26 = vrot.slane %v287_v39, %v2596_v5  ;;  %v478_v18 = vpop.permute.xlu0 %477 }
  0xed   : > { %v424_v34 = vadd.f32 %v420_v15, %v400_v2  ;;  %v444_v36 = vmul.f32 %v439_v10, %v430_v29  ;;  %v445_v41 = vmul.f32 %v443_v9, %v430_v29  ;;  %v289_v54 = vsel %vm2856_vm13, %v2800_v16, %v277_v7 }
  0xee   : > { %v425_v14 = vadd.f32 %v421_v59, %v401_v48  ;;  %v426_v49 = vadd.f32 %v422_v60, %v402_v13  ;;  %v427_v30 = vadd.f32 %v423_v25, %v403_v8  ;;  %v446_v33 = vmul.f32 %v439_v10, %v434_v62 }
  0xef   : > { %v447_v44 = vmul.f32 %v443_v9, %v434_v62  ;;  %v448_v42 = vadd.f32 %v444_v36, %v424_v34  ;;  %v487_v27 = vrot.slane %v2789_v4, %v2596_v5  ;;  %v491_v50 = vrot.slane %v289_v54, %v2596_v5  ;;  %v531_v34 = vld [vmem:[%s4087_s2 + $0x18] sm:$0xff] }
  0xf0   : > { %v454_v23 = vpop.permute.xlu1 %453  ;;  %v449_v32 = vadd.f32 %v445_v41, %v425_v14  ;;  %v450_v28 = vadd.f32 %v446_v33, %v426_v49  ;;  %v510_v61 = vpop.permute.xlu0 %509  ;;  %v530_v14 = vld [vmem:[%s4087_s2 + $0x10] sm:$0xff] }
  0xf1   : > { %v468_v38 = vmul.f32 %v463_v24, %v454_v23  ;;  %v469_v43 = vmul.f32 %v467_v26, %v454_v23  ;;  %v451_v29 = vadd.f32 %v447_v44, %v427_v30  ;;  %v492_v22 = vmul.f32 %v487_v27, %v478_v18 }
  0xf2   : > { %v493_v58 = vmul.f32 %v491_v50, %v478_v18 }
  0xf3   : > { %v472_v55 = vadd.f32 %v468_v38, %v448_v42  ;;  %v473_v56 = vadd.f32 %v469_v43, %v449_v32 }
  0xf4   : > { %v458_v31 = vpop.permute.xlu1 %457 }
  0xf5   : > { %v470_v52 = vmul.f32 %v463_v24, %v458_v31  ;;  %v471_v40 = vmul.f32 %v467_v26, %v458_v31  ;;  %v496_v2 = vadd.f32 %v492_v22, %v472_v55  ;;  %v497_v48 = vadd.f32 %v493_v58, %v473_v56  ;;  %v521_v26 = vld [vmem:[#allocation3 + $0x38] sm:$0xff] }
  0xf6   : > { %1903 = vmatprep.mubr.msk.f32.mxu0 %vm768_vm14, %v521_v26 }
  0xf7   : > { %v474_v16 = vadd.f32 %v470_v52, %v450_v28  ;;  %v475_v51 = vadd.f32 %v471_v40, %v451_v29 }
  0xf9   : > { %v482_v21 = vpop.permute.xlu1 %481 }
  0xfa   : > { %v494_v20 = vmul.f32 %v487_v27, %v482_v21  ;;  %v495_v57 = vmul.f32 %v491_v50, %v482_v21 }
  0xfc   : > { %v498_v37 = vadd.f32 %v494_v20, %v474_v16  ;;  %v499_v39 = vadd.f32 %v495_v57, %v475_v51 }
  0xfe   : > { %v514_v7 = vadd.f32 %v510_v61, %v498_v37  ;;  %v515_v4 = vadd.f32 %v510_v61, %v499_v39  ;;  %v505_v13 = vpop.permute.xlu1 %504 }
  0xff   : > { %v512_v8 = vadd.f32 %v505_v13, %v496_v2  ;;  %v513_v23 = vadd.f32 %v505_v13, %v497_v48 }
 0x100   : > { %v518_v10 = vmax.f32 %v514_v7, 0.0  ;;  %v519_v9 = vmax.f32 %v515_v4, 0.0 }
 0x101   : > { %v516_v62 = vmax.f32 %v512_v8, 0.0  ;;  %v517_v15 = vmax.f32 %v513_v23, 0.0 }
 0x103   : > { %v2130_v59 = vpack.i.bf16 %v518_v10, %v516_v62  ;;  %v2894_v24 = vpack.c.bf16 %v519_v9, %v517_v15  ;;  %v2896_v60 = vpack.c.bf16 %v518_v10, %v516_v62  ;;  %v2125_v25 = vpack.i.bf16 %v519_v9, %v517_v15 }
 0x105   : > { %2131 = vrot.lane.b32.xlu0 %v2130_v59, %s2496_s8  ;;  %2121 = vrot.lane.b32.xlu1 %v2130_v59, %s2494_s7 }
 0x109   : > { %2141 = vrot.lane.b32.xlu0 %v2130_v59, %s2497_s9  ;;  %2126 = vrot.lane.b32.xlu1 %v2125_v25, %s2494_s7 }
 0x10d   : > { %2151 = vrot.lane.b32.xlu0 %v2130_v59, %s2498_s10  ;;  %2136 = vrot.lane.b32.xlu1 %v2125_v25, %s2496_s8 }
 0x111   : > { %2161 = vrot.lane.b32.xlu0 %v2130_v59, %s2499_s11  ;;  %2146 = vrot.lane.b32.xlu1 %v2125_v25, %s2497_s9 }
 0x115   : > { %2171 = vrot.lane.b32.xlu0 %v2130_v59, %s2501_s14  ;;  %2156 = vrot.lane.b32.xlu1 %v2125_v25, %s2498_s10 }
 0x119   : > { %2181 = vrot.lane.b32.xlu0 %v2130_v59, %s2503_s15  ;;  %2166 = vrot.lane.b32.xlu1 %v2125_v25, %s2499_s11 }
 0x11d   : > { %2191 = vrot.lane.b32.xlu0 %v2130_v59, %s2505_s16  ;;  %2176 = vrot.lane.b32.xlu1 %v2125_v25, %s2501_s14 }
 0x121   : > { %2186 = vrot.lane.b32.xlu1 %v2125_v25, %s2503_s15  ;;  %750 = vperm.xlu0 %2200, %v2671_v19  }
 0x125   : > { %2196 = vrot.lane.b32.xlu1 %v2125_v25, %s2505_s16  ;;  %765 = vperm.xlu0 %2200, %v531_v34  }
 0x129   : > { %755 = vperm.xlu1 %2201, %v2659_v17   ;;  %2363 = vset.pattern.permute.xlu0 %v2495_v11 }
 0x12d   : > { %760 = vperm.xlu1 %2201, %v530_v14  }
 0x131   : > { %2362 = vset.pattern.permute.xlu1 %v2495_v11 }
 0x177   : > { %v2132_v19 = vpop.permute.xlu0 %2131  ;;  %v2122_v17 = vpop.permute.xlu1 %2121 }
 0x178   : > { %v2134_v31 = vunpack.i.h.bf16 %v2132_v19  ;;  %v2133_v54 = vunpack.i.l.bf16 %v2132_v19  ;;  %v2124_v33 = vunpack.i.h.bf16 %v2122_v17  ;;  %v2123_v44 = vunpack.i.l.bf16 %v2122_v17 }
 0x17b   : > { %v2925_v36 = vpop.permute.xlu0 %2141  ;;  %v2127_v41 = vpop.permute.xlu1 %2126 }
 0x17c   : > { %v2129_v49 = vunpack.i.h.bf16 %v2127_v41  ;;  %v2128_v30 = vunpack.i.l.bf16 %v2127_v41  ;;  %v2144_v16 = vunpack.i.h.bf16 %v2925_v36  ;;  %v2143_v51 = vunpack.i.l.bf16 %v2925_v36 }
 0x17e   : > { %v540_v18 = vsel %vm214_vm4, %v2123_v44, %v2128_v30  ;;  %v541_v11 = vsel %vm214_vm4, %v2124_v33, %v2129_v49  ;;  %v542_v39 = vsel %vm214_vm4, %v2128_v30, %v2123_v44  ;;  %v543_v23 = vsel %vm214_vm4, %v2129_v49, %v2124_v33 }
 0x17f   : > { %v2927_v38 = vpop.permute.xlu0 %2151  ;;  %v2137_v43 = vpop.permute.xlu1 %2136 }
 0x180   : > { %v2139_v52 = vunpack.i.h.bf16 %v2137_v43  ;;  %v2138_v40 = vunpack.i.l.bf16 %v2137_v43  ;;  %v2154_v20 = vunpack.i.h.bf16 %v2927_v38  ;;  %v2153_v22 = vunpack.i.l.bf16 %v2927_v38 }
 0x182   : > { %v564_v42 = vsel %vm228_vm1, %v2133_v54, %v2138_v40  ;;  %v565_v32 = vsel %vm228_vm1, %v2134_v31, %v2139_v52  ;;  %v566_v58 = vsel %vm228_vm1, %v2138_v40, %v2133_v54  ;;  %v567_v2 = vsel %vm228_vm1, %v2139_v52, %v2134_v31 }
 0x183   : > { %v2162_v27 = vpop.permute.xlu0 %2161  ;;  %v2937_v50 = vpop.permute.xlu1 %2146  ;;  %v2941_v28 = vsel %vm2724_vm6, %v564_v42, %v540_v18  ;;  %v2945_v29 = vsel %vm2724_vm6, %v565_v32, %v541_v11  ;;  %v628_v9 = vsel %vm2720_vm5, %v566_v58, %v542_v39  ;;  %v630_v34 = vsel %vm2720_vm5, %v567_v2, %v543_v23 }
 0x184   : > { %v1912_v55 = vpack.c.bf16 %v2945_v29, %v2941_v28  ;;  %v2149_v56 = vunpack.i.h.bf16 %v2937_v50  ;;  %v2148_v21 = vunpack.i.l.bf16 %v2937_v50  ;;  %v2163_v59 = vunpack.i.l.bf16 %v2162_v27 }
 0x185   : > { %v2164_v14 = vunpack.i.h.bf16 %v2162_v27  ;;  %v3023_v43 = vsel %vm2780_vm10, %v540_v18, %v564_v42 }
 0x186   : > { %1913 = vmatprep.subr.bf16.mxu0 %v1912_v55  ;;  %v601_v7 = vsel %vm249_vm2, %v2144_v16, %v2149_v56  ;;  %v600_v4 = vsel %vm249_vm2, %v2143_v51, %v2148_v21  ;;  %v3033_v55 = vsel %vm2780_vm10, %v541_v11, %v565_v32  ;;  %v602_v38 = vsel %vm249_vm2, %v2148_v21, %v2143_v51 }
 0x187   : > { %v2954_v57 = vpop.permute.xlu1 %2156  ;;  %v2965_v48 = vpop.permute.xlu0 %2171 }
 0x188   : > { %v2159_v61 = vunpack.i.h.bf16 %v2954_v57  ;;  %v2158_v37 = vunpack.i.l.bf16 %v2954_v57  ;;  %v2174_v33 = vunpack.i.h.bf16 %v2965_v48  ;;  %v2173_v44 = vunpack.i.l.bf16 %v2965_v48 }
 0x18a   : > { %v625_v13 = vsel %vm263_vm0, %v2154_v20, %v2159_v61  ;;  %v624_v8 = vsel %vm263_vm0, %v2153_v22, %v2158_v37 }
 0x18b   : > { %v2167_v10 = vpop.permute.xlu1 %2166  ;;  %v2997_v62 = vsel %vm2720_vm5, %v624_v8, %v600_v4  ;;  %v3001_v15 = vsel %vm2720_vm5, %v625_v13, %v601_v7  ;;  %v2182_v30 = vpop.permute.xlu0 %2181  ;;  %v3037_v18 = vsel %vm2776_vm9, %v600_v4, %v624_v8  ;;  %v3041_v42 = vsel %vm2776_vm9, %v601_v7, %v625_v13 }
 0x18c   : > { %v2169_v25 = vunpack.i.h.bf16 %v2167_v10  ;;  %v2168_v26 = vunpack.i.l.bf16 %v2167_v10  ;;  %v652_v19 = vsel %vm2747_vm8, %v2997_v62, %v628_v9  ;;  %v654_v17 = vsel %vm2747_vm8, %v3001_v15, %v630_v34 }
 0x18d   : > { %v1914_v41 = vpack.c.bf16 %v654_v17, %v652_v19  ;;  %v632_v8 = vsel %vm2776_vm9, %v542_v39, %v566_v58  ;;  %v2184_v58 = vunpack.i.h.bf16 %v2182_v30  ;;  %v2183_v39 = vunpack.i.l.bf16 %v2182_v30 }
 0x18e   : > { %v3013_v49 = vsel %vm221_vm7, %v2163_v59, %v2168_v26  ;;  %v3019_v54 = vsel %vm221_vm7, %v2164_v14, %v2169_v25  ;;  %v555_v10 = vsel %vm221_vm7, %v2169_v25, %v2164_v14  ;;  %v554_v9 = vsel %vm221_vm7, %v2168_v26, %v2163_v59 }
 0x18f   : > { %v3015_v31 = vpop.permute.xlu1 %2176  ;;  %1915 = vmatpush1.bf16.msra.mxu0 %v1914_v41  ;;  %v1916_v27 = vpack.c.bf16 %v3019_v54, %v3013_v49  ;;  %v634_v59 = vsel %vm2776_vm9, %v543_v23, %v567_v2  ;;  %v660_v26 = vsel %vm2747_vm8, %v3037_v18, %v632_v8  ;;  %v2192_v14 = vpop.permute.xlu0 %2191  ;;  %v1920_v41 = vpack.c.bf16 %v3033_v55, %v3023_v43 }
 0x190   : > { %v2179_v52 = vunpack.i.h.bf16 %v3015_v31  ;;  %v2178_v40 = vunpack.i.l.bf16 %v3015_v31  ;;  %v662_v34 = vsel %vm2747_vm8, %v3041_v42, %v634_v59  ;;  %v2194_v23 = vunpack.i.h.bf16 %v2192_v14 }
 0x191   : > { %1917 = vmatprep.subr.bf16.mxu0 %v1916_v27  ;;  %v1922_v2 = vpack.c.bf16 %v662_v34, %v660_v26 }
 0x192   : > { %v3053_v11 = vsel %vm256_vm3, %v2174_v33, %v2179_v52  ;;  %v3061_v32 = vsel %vm256_vm3, %v2173_v44, %v2178_v40  ;;  %v615_v51 = vsel %vm256_vm3, %v2179_v52, %v2174_v33  ;;  %v1938_v33 = vpack.c.bf16 %v3001_v15, %v2997_v62  ;;  %v520_v15 = vld [vmem:[#allocation3 + $0x30] sm:$0xff] }
 0x193   : > { %v2187_v7 = vpop.permute.xlu1 %2186  ;;  %v656_v4 = vsel %vm2747_vm8, %v3061_v32, %v554_v9  ;;  %v658_v13 = vsel %vm2747_vm8, %v3053_v11, %v555_v10  ;;  %v2193_v10 = vunpack.i.l.bf16 %v2192_v14  ;;  %v1942_v52 = vpack.c.bf16 %v3053_v11, %v3061_v32  ;;  %v526_v11 = vld [vmem:[#allocation3 + $0x78] sm:$0xff] }
 0x194   : > { %v1918_v25 = vpack.c.bf16 %v658_v13, %v656_v4  ;;  %v2189_v19 = vunpack.i.h.bf16 %v2187_v7  ;;  %v2188_v17 = vunpack.i.l.bf16 %v2187_v7  ;;  %v1946_v62 = vpack.c.bf16 %v3041_v42, %v3037_v18 }
 0x196   : > { %1919 = vmatpush1.bf16.msra.mxu0 %v1918_v25  ;;  %v577_v13 = vsel %vm235_vm11, %v2184_v58, %v2189_v19  ;;  %v579_v8 = vsel %vm235_vm11, %v2189_v19, %v2184_v58  ;;  %v576_v7 = vsel %vm235_vm11, %v2183_v39, %v2188_v17  ;;  %v578_v59 = vsel %vm235_vm11, %v2188_v17, %v2183_v39 }
 0x197   : > { %v2197_v27 = vpop.permute.xlu1 %2196  ;;  %1921 = vmatprep.subr.bf16.mxu0 %v1920_v41 }
 0x198   : > { %v2199_v9 = vunpack.i.h.bf16 %v2197_v27  ;;  %v2198_v4 = vunpack.i.l.bf16 %v2197_v27  ;;  %v627_v27 = vsel %vm263_vm0, %v2159_v61, %v2154_v20 }
 0x19a   : > { %v589_v30 = vsel %vm242_vm12, %v2194_v23, %v2199_v9  ;;  %v591_v25 = vsel %vm242_vm12, %v2199_v9, %v2194_v23  ;;  %v588_v26 = vsel %vm242_vm12, %v2193_v10, %v2198_v4  ;;  %v590_v34 = vsel %vm242_vm12, %v2198_v4, %v2193_v10  ;;  %1923 = vmatpush1.bf16.msra.mxu0 %v1922_v2  ;;  %v523_v10 = vld [vmem:[#allocation3 + $0x50] sm:$0xff]  ;;  %v525_v9 = vld [vmem:[#allocation3 + $0x68] sm:$0xff]  ;;  %v527_v4 = vld [vmem:[#allocation3 + $0x80] sm:$0xff] }
 0x19b   : > { %v637_v14 = vsel %vm2724_vm6, %v590_v34, %v576_v7  ;;  %v639_v19 = vsel %vm2724_vm6, %v591_v25, %v577_v13  ;;  %v636_v17 = vsel %vm2720_vm5, %v588_v26, %v578_v59  ;;  %v638_v41 = vsel %vm2720_vm5, %v589_v30, %v579_v8 }
 0x19c   : > { %v1924_v58 = vpack.c.bf16 %v639_v19, %v637_v14  ;;  %v1926_v39 = vpack.c.bf16 %v638_v41, %v636_v17  ;;  %v626_v2 = vsel %vm263_vm0, %v2158_v37, %v2153_v22  ;;  %v603_v23 = vsel %vm249_vm2, %v2149_v56, %v2144_v16 }
 0x19d   : > { %v641_v20 = vsel %vm2780_vm10, %v576_v7, %v590_v34  ;;  %v643_v57 = vsel %vm2780_vm10, %v577_v13, %v591_v25  ;;  %v645_v22 = vsel %vm2724_vm6, %v626_v2, %v602_v38  ;;  %v647_v36 = vsel %vm2724_vm6, %v627_v27, %v603_v23 }
 0x19e   : > { %1925 = vmatprep.subr.bf16.mxu0 %v1924_v58  ;;  %v1932_v56 = vpack.c.bf16 %v643_v57, %v641_v20  ;;  %v640_v50 = vsel %vm2776_vm9, %v578_v59, %v588_v26  ;;  %v642_v21 = vsel %vm2776_vm9, %v579_v8, %v589_v30  ;;  %v665_v16 = vsel %vm2856_vm13, %v2941_v28, %v645_v22 }
 0x19f   : > { %1927 = vmatpush1.bf16.msra.mxu0 %v1926_v39  ;;  %v1934_v28 = vpack.c.bf16 %v642_v21, %v640_v50  ;;  %v671_v37 = vsel %vm2856_vm13, %v3019_v54, %v615_v51  ;;  %v649_v48 = vsel %vm2780_vm10, %v602_v38, %v626_v2  ;;  %v651_v31 = vsel %vm2780_vm10, %v603_v23, %v627_v27 }
 0x1a0   : > { %1929 = vmatprep.subr.bf16.mxu0 %v2894_v24  ;;  %v667_v24 = vsel %vm2856_vm13, %v2945_v29, %v647_v36  ;;  %v675_v54 = vsel %vm2856_vm13, %v3033_v55, %v651_v31  ;;  %v524_v55 = vld [vmem:[#allocation3 + $0x60] sm:$0xff]  ;;  %v751_v32 = vpop.permute.xlu0 %750 }
 0x1a1   : > { %v1936_v61 = vpack.c.bf16 %v667_v24, %v665_v16  ;;  %v884_v31 = vld [vmem:[%s4087_s2] sm:$0xff] }
 0x1a3   : > { %1931 = vmatpush1.bf16.msra.mxu0 %v2896_v60  ;;  %v614_v60 = vsel %vm256_vm3, %v2178_v40, %v2173_v44 }
 0x1a4   : > { %1933 = vmatprep.subr.bf16.mxu0 %v1932_v56  ;;  %v669_v29 = vsel %vm2856_vm13, %v3013_v49, %v614_v60  ;;  %v673_v49 = vsel %vm2856_vm13, %v3023_v43, %v649_v48  ;;  %v522_v43 = vld [vmem:[#allocation3 + $0x48] sm:$0xff]  ;;  %v766_v57 = vpop.permute.xlu0 %765  ;;  %v879_v48 = vld [vmem:[#allocation3 + $0x98] sm:$0xff] }
 0x1a5   : > { %v1940_v44 = vpack.c.bf16 %v671_v37, %v669_v29  ;;  %v1944_v40 = vpack.c.bf16 %v675_v54, %v673_v49  ;;  %1399 = vmatprep.mubr.f32.mxu1 %v879_v48 }
 0x1a7   : > { %1935 = vmatpush1.bf16.msra.mxu0 %v1934_v28 }
 0x1a8   : > { %1937 = vmatprep.subr.bf16.mxu0 %v1936_v61  ;;  %v756_v8 = vpop.permute.xlu1 %755 }
 0x1ab   : > { %1939 = vmatpush1.bf16.msra.mxu0 %v1938_v33  ;;  %v885_v33 = vld [vmem:[%s4087_s2 + $0x8] sm:$0xff] }
 0x1ac   : > { %1941 = vmatprep.subr.bf16.mxu0 %v1940_v44  ;;  %v761_v2 = vpop.permute.xlu1 %760 }
 0x1af   : > { %1943 = vmatpush1.bf16.msra.mxu0 %v1942_v52 }
 0x1b0   : > { %1945 = vmatprep.subr.bf16.mxu0 %v1944_v40 }
 0x1b3   : > { %1947 = vmatpush1.bf16.msra.mxu0 %v1946_v62 }
 0x1b6   : > { %846 = vmatmul.mubr.f32.vlgmr.msra.gmra.mrb[0].mxu0 %v520_v15 }
 0x1b7   : > { %1904 = vmatprep.mubr.msk.f32.mxu0 %vm768_vm14, %v523_v10 }
 0x1ba   : > { %852 = vmatmul.mubr.f32.gmra.mrb[2].mxu0 %v522_v43 }
 0x1bb   : > { %1905 = vmatprep.mubr.msk.f32.mxu0 %vm768_vm14, %v525_v9 }
 0x1be   : > { %858 = vmatmul.mubr.f32.gmra.mrb[4].mxu0 %v524_v55 }
 0x1bf   : > { %1906 = vmatprep.mubr.msk.f32.mxu0 %vm768_vm14, %v527_v4 }
 0x1c2   : > { %864 = vmatmul.mubr.f32.gmra.mrb[6].mxu0 %v526_v11 }
 0x289   : > { %v847_v18 = vpop.f32.mrb[0].mxu0 }
 0x28a   : > { %v849_v42 = vpop.f32.mrb[1].mxu0  ;;  %v848_v13 = vadd.f32 %v847_v18, %v751_v32 }
 0x28b   : > { %v850_v7 = vadd.f32 %v849_v42, %v751_v32 }
 0x28c   : > { %v870_v34 = vmax.f32 %v848_v13, 0.0 }
 0x28d   : > { %v853_v59 = vpop.f32.mrb[2].mxu0  ;;  %v871_v19 = vmax.f32 %v850_v7, 0.0 }
 0x28e   : > { %v854_v30 = vadd.f32 %v853_v59, %v756_v8  ;;  %v855_v25 = vpop.f32.mrb[3].mxu0 }
 0x28f   : > { %v856_v26 = vadd.f32 %v855_v25, %v756_v8 }
 0x290   : > { %v872_v14 = vmax.f32 %v854_v30, 0.0 }
 0x291   : > { %v873_v17 = vmax.f32 %v856_v26, 0.0  ;;  %v859_v41 = vpop.f32.mrb[4].mxu0 }
 0x292   : > { %v861_v58 = vpop.f32.mrb[5].mxu0  ;;  %v2202_v39 = vpack.i.bf16 %v872_v14, %v870_v34  ;;  %v3186_v27 = vpack.c.bf16 %v872_v14, %v870_v34  ;;  %v860_v20 = vadd.f32 %v859_v41, %v761_v2 }
 0x293   : > { %v2232_v23 = vpack.i.bf16 %v873_v17, %v871_v19  ;;  %v3188_v38 = vpack.c.bf16 %v873_v17, %v871_v19  ;;  %v862_v22 = vadd.f32 %v861_v58, %v761_v2 }
 0x294   : > { %2203 = vrot.lane.b32.xlu1 %v2202_v39, %s2494_s7  ;;  %v874_v16 = vmax.f32 %v860_v20, 0.0 }
 0x295   : > { %v865_v36 = vpop.f32.mrb[6].mxu0  ;;  %2233 = vrot.lane.b32.xlu0 %v2232_v23, %s2494_s7  ;;  %v875_v51 = vmax.f32 %v862_v22, 0.0 }
 0x296   : > { %v866_v56 = vadd.f32 %v865_v36, %v766_v57  ;;  %v867_v50 = vpop.f32.mrb[7].mxu0 }
 0x297   : > { %v868_v21 = vadd.f32 %v867_v50, %v766_v57 }
 0x298   : > { %v876_v24 = vmax.f32 %v866_v56, 0.0  ;;  %2208 = vrot.lane.b32.xlu1 %v2202_v39, %s2496_s8 }
 0x299   : > { %v877_v60 = vmax.f32 %v868_v21, 0.0  ;;  %2238 = vrot.lane.b32.xlu0 %v2232_v23, %s2496_s8 }
 0x29a   : > { %v2262_v28 = vpack.i.bf16 %v876_v24, %v874_v16  ;;  %v3198_v37 = vpack.c.bf16 %v876_v24, %v874_v16 }
 0x29b   : > { %v2297_v61 = vpack.i.bf16 %v877_v60, %v875_v51  ;;  %v3196_v29 = vpack.c.bf16 %v877_v60, %v875_v51 }
 0x29c   : > { %2213 = vrot.lane.b32.xlu1 %v2202_v39, %s2497_s9 }
 0x29d   : > { %2243 = vrot.lane.b32.xlu0 %v2232_v23, %s2497_s9 }
 0x2a0   : > { %2218 = vrot.lane.b32.xlu1 %v2202_v39, %s2498_s10 }
 0x2a1   : > { %2248 = vrot.lane.b32.xlu0 %v2232_v23, %s2498_s10 }
 0x2a4   : > { %2223 = vrot.lane.b32.xlu1 %v2202_v39, %s2499_s11 }
 0x2a5   : > { %2253 = vrot.lane.b32.xlu0 %v2232_v23, %s2499_s11 }
 0x2a8   : > { %2228 = vrot.lane.b32.xlu1 %v2202_v39, %s2501_s14 }
 0x2a9   : > { %2258 = vrot.lane.b32.xlu0 %v2232_v23, %s2501_s14 }
 0x2ac   : > { %2263 = vrot.lane.b32.xlu1 %v2262_v28, %s2494_s7 }
 0x2ad   : > { %2298 = vrot.lane.b32.xlu0 %v2297_v61, %s2494_s7 }
 0x2b0   : > { %2268 = vrot.lane.b32.xlu1 %v2262_v28, %s2496_s8 }
 0x2b1   : > { %2303 = vrot.lane.b32.xlu0 %v2297_v61, %s2496_s8 }
 0x2b4   : > { %2273 = vrot.lane.b32.xlu1 %v2262_v28, %s2497_s9 }
 0x2b5   : > { %2308 = vrot.lane.b32.xlu0 %v2297_v61, %s2497_s9 }
 0x2b8   : > { %2278 = vrot.lane.b32.xlu1 %v2262_v28, %s2498_s10 }
 0x2b9   : > { %2313 = vrot.lane.b32.xlu0 %v2297_v61, %s2498_s10 }
 0x2bc   : > { %2283 = vrot.lane.b32.xlu1 %v2262_v28, %s2499_s11 }
 0x2bd   : > { %2318 = vrot.lane.b32.xlu0 %v2297_v61, %s2499_s11 }
 0x2c0   : > { %2288 = vrot.lane.b32.xlu1 %v2262_v28, %s2501_s14 }
 0x2c1   : > { %2323 = vrot.lane.b32.xlu0 %v2297_v61, %s2501_s14 }
 0x2c4   : > { %2293 = vrot.lane.b32.xlu1 %v2202_v39, %s2503_s15 }
 0x2c5   : > { %2328 = vrot.lane.b32.xlu0 %v2232_v23, %s2503_s15 }
 0x2c8   : > { %2333 = vrot.lane.b32.xlu1 %v2202_v39, %s2505_s16 }
 0x2c9   : > { %2338 = vrot.lane.b32.xlu0 %v2232_v23, %s2505_s16 }
 0x2cc   : > { %2343 = vrot.lane.b32.xlu1 %v2262_v28, %s2503_s15 }
 0x2cd   : > { %2353 = vrot.lane.b32.xlu0 %v2297_v61, %s2503_s15 }
 0x2d0   : > { %2348 = vrot.lane.b32.xlu1 %v2262_v28, %s2505_s16 }
 0x2d1   : > { %2358 = vrot.lane.b32.xlu0 %v2297_v61, %s2505_s16 }
 0x2d4   : > { %1320 = vperm.xlu1 %2362, %v884_v31  }
 0x2d5   : > { %1325 = vperm.xlu0 %2363, %v885_v33  }
 0x2d9   : > { %2444 = vset.pattern.permute.xlu0 %v2500_v12 }
 0x306   : > { %v2204_v44 = vpop.permute.xlu1 %2203 }
 0x307   : > { %v2234_v49 = vpop.permute.xlu0 %2233  ;;  %v2206_v54 = vunpack.i.h.bf16 %v2204_v44  ;;  %v2205_v52 = vunpack.i.l.bf16 %v2204_v44 }
 0x308   : > { %v2236_v40 = vunpack.i.h.bf16 %v2234_v49  ;;  %v2235_v62 = vunpack.i.l.bf16 %v2234_v49 }
 0x30a   : > { %v2209_v15 = vpop.permute.xlu1 %2208  ;;  %v902_v32 = vsel %vm214_vm4, %v2205_v52, %v2235_v62  ;;  %v903_v18 = vsel %vm214_vm4, %v2206_v54, %v2236_v40  ;;  %v3259_v22 = vsel %vm214_vm4, %v2235_v62, %v2205_v52  ;;  %v3263_v36 = vsel %vm214_vm4, %v2236_v40, %v2206_v54 }
 0x30b   : > { %v2211_v10 = vunpack.i.h.bf16 %v2209_v15  ;;  %v2210_v43 = vunpack.i.l.bf16 %v2209_v15  ;;  %v2239_v9 = vpop.permute.xlu0 %2238 }
 0x30c   : > { %v2241_v55 = vunpack.i.h.bf16 %v2239_v9  ;;  %v2240_v4 = vunpack.i.l.bf16 %v2239_v9 }
 0x30e   : > { %v2214_v11 = vpop.permute.xlu1 %2213  ;;  %v950_v12 = vsel %vm228_vm1, %v2210_v43, %v2240_v4  ;;  %v951_v42 = vsel %vm228_vm1, %v2211_v10, %v2241_v55  ;;  %v3251_v2 = vsel %vm228_vm1, %v2240_v4, %v2210_v43  ;;  %v3255_v23 = vsel %vm228_vm1, %v2241_v55, %v2211_v10 }
 0x30f   : > { %v2216_v13 = vunpack.i.h.bf16 %v2214_v11  ;;  %v2215_v8 = vunpack.i.l.bf16 %v2214_v11  ;;  %v2244_v7 = vpop.permute.xlu0 %2243  ;;  %v1079_v59 = vsel %vm2724_vm6, %v950_v12, %v902_v32  ;;  %v1081_v30 = vsel %vm2724_vm6, %v951_v42, %v903_v18 }
 0x310   : > { %v2246_v25 = vunpack.i.h.bf16 %v2244_v7  ;;  %v2245_v26 = vunpack.i.l.bf16 %v2244_v7  ;;  %v1948_v34 = vpack.c.bf16 %v1081_v30, %v1079_v59  ;;  %v1078_v61 = vsel %vm2720_vm5, %v3251_v2, %v3259_v22 }
 0x311   : > { %v1080_v48 = vsel %vm2720_vm5, %v3255_v23, %v3263_v36 }
 0x312   : > { %v1026_v14 = vsel %vm249_vm2, %v2245_v26, %v2215_v8  ;;  %v1027_v19 = vsel %vm249_vm2, %v2246_v25, %v2216_v13  ;;  %v2219_v17 = vpop.permute.xlu1 %2218  ;;  %1949 = vmatprep.subr.bf16.mxu1 %v1948_v34  ;;  %v3267_v56 = vsel %vm249_vm2, %v2215_v8, %v2245_v26  ;;  %v3271_v50 = vsel %vm249_vm2, %v2216_v13, %v2246_v25 }
 0x313   : > { %v2221_v41 = vunpack.i.h.bf16 %v2219_v17  ;;  %v2220_v58 = vunpack.i.l.bf16 %v2219_v17  ;;  %v2249_v39 = vpop.permute.xlu0 %2248  ;;  %v3337_v13 = vsel %vm2780_vm10, %v902_v32, %v950_v12 }
 0x314   : > { %v2251_v20 = vunpack.i.h.bf16 %v2249_v39  ;;  %v2250_v57 = vunpack.i.l.bf16 %v2249_v39 }
 0x316   : > { %v3275_v21 = vsel %vm263_vm0, %v2220_v58, %v2250_v57  ;;  %v3279_v16 = vsel %vm263_vm0, %v2221_v41, %v2251_v20  ;;  %v1074_v24 = vsel %vm263_vm0, %v2250_v57, %v2220_v58  ;;  %v1075_v51 = vsel %vm263_vm0, %v2251_v20, %v2221_v41  ;;  %v3285_v60 = vpop.permute.xlu1 %2223 }
 0x317   : > { %v3287_v28 = vpop.permute.xlu0 %2253  ;;  %v3301_v31 = vsel %vm2720_vm5, %v3275_v21, %v3267_v56  ;;  %v3307_v33 = vsel %vm2720_vm5, %v3279_v16, %v3271_v50  ;;  %v1111_v52 = vsel %vm2724_vm6, %v1074_v24, %v1026_v14  ;;  %v1113_v15 = vsel %vm2724_vm6, %v1075_v51, %v1027_v19 }
 0x318   : > { %4135 = vst [vmem:[#allocation9_spill] sm:$0xff] %v3301_v31  ;;  %4136 = vst [vmem:[#allocation10_spill] sm:$0xff] %v3307_v33  ;;  %v1126_v44 = vsel %vm2747_vm8, %v3301_v31, %v1078_v61  ;;  %v1128_v49 = vsel %vm2747_vm8, %v3307_v33, %v1080_v48  ;;  %v3325_v10 = vsel %vm2856_vm13, %v1079_v59, %v1111_v52  ;;  %v2226_v57 = vunpack.i.h.bf16 %v3285_v60 }
 0x319   : > { %v1950_v54 = vpack.c.bf16 %v1128_v49, %v1126_v44  ;;  %4137 = vst [vmem:[#allocation11_spill] sm:$0xff] %v3325_v10  ;;  %v3329_v43 = vsel %vm2856_vm13, %v1081_v30, %v1113_v15  ;;  %v1119_v8 = vsel %vm2780_vm10, %v1026_v14, %v1074_v24  ;;  %v3343_v58 = vsel %vm2780_vm10, %v903_v18, %v951_v42 }
 0x31a   : > { %v3317_v40 = vpop.permute.xlu1 %2228  ;;  %4138 = vst [vmem:[#allocation12_spill] sm:$0xff] %v3329_v43  ;;  %v1121_v39 = vsel %vm2780_vm10, %v1027_v19, %v1075_v51  ;;  %v3350_v14 = vsel %vm2856_vm13, %v3337_v13, %v1119_v8  ;;  %v2225_v18 = vunpack.i.l.bf16 %v3285_v60  ;;  %v2256_v48 = vunpack.i.h.bf16 %v3287_v28 }
 0x31b   : > { %v3319_v62 = vpop.permute.xlu0 %2258  ;;  %1951 = vmatpush1.bf16.msra.mxu1 %v1950_v54  ;;  %4139 = vst [vmem:[#allocation13_spill] sm:$0xff] %v3350_v14  ;;  %v3355_v20 = vsel %vm2856_vm13, %v3343_v58, %v1121_v39  ;;  %v2255_v44 = vunpack.i.l.bf16 %v3287_v28  ;;  %v4094_v15 = vunpack.i.h.bf16 %v3317_v40 }
 0x31c   : > { %4140 = vst [vmem:[#allocation14_spill] sm:$0xff] %v3355_v20  ;;  %v4095_v8 = vunpack.i.l.bf16 %v3319_v62 }
 0x31e   : > { %v2264_v55 = vpop.permute.xlu1 %2263 }
 0x31f   : > { %v2299_v4 = vpop.permute.xlu0 %2298  ;;  %v2266_v7 = vunpack.i.h.bf16 %v2264_v55  ;;  %v2265_v59 = vunpack.i.l.bf16 %v2264_v55  ;;  %v4096_v55 = vunpack.i.l.bf16 %v3317_v40 }
 0x320   : > { %v2301_v25 = vunpack.i.h.bf16 %v2299_v4  ;;  %v2300_v30 = vunpack.i.l.bf16 %v2299_v4  ;;  %v4093_v4 = vunpack.i.h.bf16 %v3319_v62 }
 0x321   : > { %v3443_v6 = vsel %vm256_vm3, %v4096_v55, %v4095_v8 }
 0x322   : > { %v2269_v26 = vpop.permute.xlu1 %2268  ;;  %v3363_v19 = vsel %vm214_vm4, %v2265_v59, %v2300_v30  ;;  %v3367_v24 = vsel %vm214_vm4, %v2266_v7, %v2301_v25  ;;  %v3429_v39 = vsel %vm214_vm4, %v2300_v30, %v2265_v59 }
 0x323   : > { %v2271_v34 = vunpack.i.h.bf16 %v2269_v26  ;;  %v2270_v17 = vunpack.i.l.bf16 %v2269_v26  ;;  %v2304_v41 = vpop.permute.xlu0 %2303 }
 0x324   : > { %v2306_v32 = vunpack.i.h.bf16 %v2304_v41  ;;  %v2305_v12 = vunpack.i.l.bf16 %v2304_v41 }
 0x326   : > { %v3371_v51 = vsel %vm228_vm1, %v2270_v17, %v2305_v12  ;;  %v3375_v61 = vsel %vm228_vm1, %v2271_v34, %v2306_v32  ;;  %v3377_v60 = vpop.permute.xlu1 %2273  ;;  %v3403_v26 = vsel %vm228_vm1, %v2305_v12, %v2270_v17  ;;  %v3407_v41 = vsel %vm228_vm1, %v2306_v32, %v2271_v34 }
 0x327   : > { %v3381_v49 = vpop.permute.xlu0 %2308  ;;  %v3387_v54 = vsel %vm2724_vm6, %v3371_v51, %v3363_v19  ;;  %v3393_v52 = vsel %vm2724_vm6, %v3375_v61, %v3367_v24  ;;  %v4101_v0 = vunpack.i.l.bf16 %v3377_v60  ;;  %v3421_v34 = vsel %vm221_vm7, %v2225_v18, %v2255_v44 }
 0x328   : > { %v1952_v28 = vpack.c.bf16 %v3393_v52, %v3387_v54  ;;  %v4100_v42 = vunpack.i.l.bf16 %v3381_v49  ;;  %v3425_v32 = vsel %vm221_vm7, %v2226_v57, %v2256_v48  ;;  %v1082_v59 = vsel %vm2720_vm5, %v3403_v26, %v3429_v39 }
 0x32a   : > { %v3413_v9 = vpop.permute.xlu1 %2278  ;;  %1953 = vmatprep.subr.bf16.mxu1 %v1952_v28  ;;  %v3433_v28 = vsel %vm214_vm4, %v2301_v25, %v2266_v7  ;;  %v3451_v7 = vsel %vm256_vm3, %v4094_v15, %v4093_v4  ;;  %v1024_v30 = vsel %vm249_vm2, %v4101_v0, %v4100_v42  ;;  %v4141_v4 = vunpack.i.h.bf16 %v3381_v49 }
 0x32b   : > { %v3417_v12 = vpop.permute.xlu0 %2313  ;;  %v1084_v25 = vsel %vm2720_vm5, %v3407_v41, %v3433_v28  ;;  %v4142_v15 = vunpack.i.h.bf16 %v3377_v60  ;;  %v4143_v55 = vunpack.i.l.bf16 %v3413_v9  ;;  %v4145_v3 = vunpack.i.h.bf16 %v3413_v9 }
 0x32c   : > { %v4105_v17 = vunpack.i.l.bf16 %v3417_v12  ;;  %v4144_v5 = vunpack.i.h.bf16 %v3417_v12 }
 0x32d   : > { %v1025_v8 = vsel %vm249_vm2, %v4142_v15, %v4141_v4 }
 0x32e   : > { %v1072_v11 = vsel %vm263_vm0, %v4143_v55, %v4105_v17  ;;  %v1073_v42 = vsel %vm263_vm0, %v4145_v3, %v4144_v5  ;;  %v2284_v0 = vpop.permute.xlu1 %2283  ;;  %v931_v5 = vsel %vm221_vm7, %v2256_v48, %v2226_v57 }
 0x32f   : > { %v2286_v14 = vunpack.i.h.bf16 %v2284_v0  ;;  %v2285_v20 = vunpack.i.l.bf16 %v2284_v0  ;;  %v2319_v31 = vpop.permute.xlu0 %2318  ;;  %v3487_v15 = vsel %vm2720_vm5, %v1072_v11, %v1024_v30  ;;  %v3491_v4 = vsel %vm2720_vm5, %v1073_v42, %v1025_v8 }
 0x330   : > { %4146 = vst [vmem:[#allocation15_spill] sm:$0xff] %v3491_v4  ;;  %v2321_v55 = vunpack.i.h.bf16 %v2319_v31  ;;  %v2320_v17 = vunpack.i.l.bf16 %v2319_v31  ;;  %v1130_v33 = vsel %vm2747_vm8, %v3487_v15, %v1082_v59  ;;  %v1132_v3 = vsel %vm2747_vm8, %v3491_v4, %v1084_v25 }
 0x331   : > { %v930_v0 = vsel %vm221_vm7, %v2255_v44, %v2225_v18  ;;  %v1954_v10 = vpack.c.bf16 %v1132_v3, %v1130_v33  ;;  %v1956_v31 = vpack.c.bf16 %v3425_v32, %v3421_v34  ;;  %v1136_v25 = vsel %vm2747_vm8, %v3451_v7, %v931_v5 }
 0x332   : > { %v3503_v43 = vpop.permute.xlu1 %2288  ;;  %v1134_v59 = vsel %vm2747_vm8, %v3443_v6, %v930_v0  ;;  %v3519_v33 = vsel %vm221_vm7, %v2285_v20, %v2320_v17  ;;  %v3523_v57 = vsel %vm221_vm7, %v2286_v14, %v2321_v55  ;;  %v932_v0 = vsel %vm221_vm7, %v2320_v17, %v2285_v20 }
 0x333   : > { %v4111_v18 = vunpack.i.l.bf16 %v3503_v43  ;;  %v3515_v44 = vpop.permute.xlu0 %2323  ;;  %1955 = vmatpush1.bf16.msra.mxu1 %v1954_v10  ;;  %v1958_v5 = vpack.c.bf16 %v1136_v25, %v1134_v59  ;;  %v3533_v10 = vsel %vm2776_vm9, %v3267_v56, %v3275_v21  ;;  %v3539_v4 = vsel %vm2776_vm9, %v3271_v50, %v3279_v16 }
 0x334   : > { %v4110_v3 = vunpack.i.l.bf16 %v3515_v44  ;;  %1957 = vmatprep.subr.bf16.mxu1 %v1956_v31  ;;  %v933_v48 = vsel %vm221_vm7, %v2321_v55, %v2286_v14  ;;  %v4147_v56 = vunpack.i.h.bf16 %v3515_v44  ;;  %v4148_v21 = vunpack.i.h.bf16 %v3503_v43 }
 0x335   : > { %v1960_v16 = vpack.c.bf16 %v3523_v57, %v3519_v33  ;;  %v1086_v59 = vsel %vm2776_vm9, %v3259_v22, %v3251_v2  ;;  %v1088_v25 = vsel %vm2776_vm9, %v3263_v36, %v3255_v23  ;;  %v3587_v2 = vsel %vm2780_vm10, %v3363_v19, %v3371_v51 }
 0x336   : > { %v3549_v20 = vsel %vm256_vm3, %v4111_v18, %v4110_v3  ;;  %v3557_v17 = vsel %vm256_vm3, %v4148_v21, %v4147_v56  ;;  %v2294_v50 = vpop.permute.xlu1 %2293  ;;  %v1964_v56 = vpack.c.bf16 %v3343_v58, %v3337_v13  ;;  %v3593_v23 = vsel %vm2780_vm10, %v3367_v24, %v3375_v61 }
 0x337   : > { %v2329_v14 = vpop.permute.xlu0 %2328  ;;  %1959 = vmatpush1.bf16.msra.mxu1 %v1958_v5  ;;  %v1138_v55 = vsel %vm2747_vm8, %v3549_v20, %v932_v0  ;;  %v1140_v31 = vsel %vm2747_vm8, %v3557_v17, %v933_v48  ;;  %v1142_v0 = vsel %vm2747_vm8, %v3533_v10, %v1086_v59  ;;  %v1144_v48 = vsel %vm2747_vm8, %v3539_v4, %v1088_v25 }
 0x338   : > { %1961 = vmatprep.subr.bf16.mxu1 %v1960_v16  ;;  %v1962_v5 = vpack.c.bf16 %v1140_v31, %v1138_v55  ;;  %v3597_v22 = vsel %vm2776_vm9, %v1024_v30, %v1072_v11  ;;  %v3601_v36 = vsel %vm2776_vm9, %v1025_v8, %v1073_v42  ;;  %v2296_v13 = vunpack.i.h.bf16 %v2294_v50 }
 0x339   : > { %4149 = vst [vmem:[#allocation16_spill] sm:$0xff] %v3601_v36  ;;  %v2295_v58 = vunpack.i.l.bf16 %v2294_v50  ;;  %v2331_v21 = vunpack.i.h.bf16 %v2329_v14  ;;  %v2330_v16 = vunpack.i.l.bf16 %v2329_v14  ;;  %v1090_v11 = vsel %vm2776_vm9, %v3429_v39, %v3403_v26 }
 0x33a   : > { %v2334_v19 = vpop.permute.xlu1 %2333  ;;  %v1092_v42 = vsel %vm2776_vm9, %v3433_v28, %v3407_v41  ;;  %v1966_v61 = vpack.c.bf16 %v1144_v48, %v1142_v0  ;;  %v1968_v8 = vpack.c.bf16 %v3593_v23, %v3587_v2  ;;  %v1146_v30 = vsel %vm2747_vm8, %v3597_v22, %v1090_v11 }
 0x33b   : > { %v2336_v51 = vunpack.i.h.bf16 %v2334_v19  ;;  %v2335_v55 = vunpack.i.l.bf16 %v2334_v19  ;;  %v2339_v31 = vpop.permute.xlu0 %2338  ;;  %1963 = vmatpush1.bf16.msra.mxu1 %v1962_v5  ;;  %v1148_v50 = vsel %vm2747_vm8, %v3601_v36, %v1092_v42  ;;  %v974_v26 = vsel %vm235_vm11, %v2295_v58, %v2330_v16 }
 0x33c   : > { %v2341_v59 = vunpack.i.h.bf16 %v2339_v31  ;;  %v2340_v24 = vunpack.i.l.bf16 %v2339_v31  ;;  %1965 = vmatprep.subr.bf16.mxu1 %v1964_v56  ;;  %v975_v39 = vsel %vm235_vm11, %v2296_v13, %v2331_v21  ;;  %v1970_v11 = vpack.c.bf16 %v1148_v50, %v1146_v30 }
 0x33d   : > { %v978_v42 = vsel %vm235_vm11, %v2330_v16, %v2295_v58 }
 0x33e   : > { %v1002_v41 = vsel %vm242_vm12, %v2340_v24, %v2335_v55  ;;  %v1003_v28 = vsel %vm242_vm12, %v2341_v59, %v2336_v51  ;;  %v2344_v14 = vpop.permute.xlu1 %2343  ;;  %v998_v25 = vsel %vm242_vm12, %v2335_v55, %v2340_v24  ;;  %v999_v5 = vsel %vm242_vm12, %v2336_v51, %v2341_v59 }
 0x33f   : > { %v2354_v56 = vpop.permute.xlu0 %2353  ;;  %1967 = vmatpush1.bf16.msra.mxu1 %v1966_v61  ;;  %v1095_v0 = vsel %vm2724_vm6, %v1002_v41, %v974_v26  ;;  %v1097_v48 = vsel %vm2724_vm6, %v1003_v28, %v975_v39  ;;  %v2345_v19 = vunpack.i.l.bf16 %v2344_v14  ;;  %v979_v55 = vsel %vm235_vm11, %v2331_v21, %v2296_v13 }
 0x340   : > { %v2355_v31 = vunpack.i.l.bf16 %v2354_v56  ;;  %1969 = vmatprep.subr.bf16.mxu1 %v1968_v8  ;;  %v2346_v24 = vunpack.i.h.bf16 %v2344_v14  ;;  %v2356_v51 = vunpack.i.h.bf16 %v2354_v56  ;;  %v1972_v61 = vpack.c.bf16 %v1097_v48, %v1095_v0 }
 0x341   : > { %v1094_v3 = vsel %vm2720_vm5, %v998_v25, %v978_v42  ;;  %v1096_v18 = vsel %vm2720_vm5, %v999_v5, %v979_v55 }
 0x342   : > { %v2349_v59 = vpop.permute.xlu1 %2348  ;;  %v976_v58 = vsel %vm235_vm11, %v2345_v19, %v2355_v31  ;;  %v977_v13 = vsel %vm235_vm11, %v2346_v24, %v2356_v51  ;;  %v980_v21 = vsel %vm235_vm11, %v2355_v31, %v2345_v19  ;;  %v981_v50 = vsel %vm235_vm11, %v2356_v51, %v2346_v24 }
 0x343   : > { %v2351_v53 = vunpack.i.h.bf16 %v2349_v59  ;;  %v2350_v36 = vunpack.i.l.bf16 %v2349_v59  ;;  %v2359_v8 = vpop.permute.xlu0 %2358  ;;  %1971 = vmatpush1.bf16.msra.mxu1 %v1970_v11  ;;  %v1974_v14 = vpack.c.bf16 %v1096_v18, %v1094_v3 }
 0x344   : > { %v2361_v16 = vunpack.i.h.bf16 %v2359_v8  ;;  %v2360_v30 = vunpack.i.l.bf16 %v2359_v8  ;;  %1973 = vmatprep.subr.bf16.mxu1 %v1972_v61  ;;  %v1102_v61 = vsel %vm2776_vm9, %v978_v42, %v998_v25  ;;  %v1104_v8 = vsel %vm2776_vm9, %v979_v55, %v999_v5 }
 0x345   : > { %v1990_v25 = vpack.c.bf16 %v1104_v8, %v1102_v61  ;;  %v4170_v8 = vunpack.i.h.bf16 %v3503_v43 }
 0x346   : > { %v1000_v56 = vsel %vm242_vm12, %v2350_v36, %v2360_v30  ;;  %v1001_v0 = vsel %vm242_vm12, %v2351_v53, %v2361_v16  ;;  %v1004_v48 = vsel %vm242_vm12, %v2360_v30, %v2350_v36  ;;  %v1005_v11 = vsel %vm242_vm12, %v2361_v16, %v2351_v53 }
 0x347   : > { %1975 = vmatpush1.bf16.msra.mxu1 %v1974_v14  ;;  %v1099_v19 = vsel %vm2724_vm6, %v1004_v48, %v976_v58  ;;  %v1101_v31 = vsel %vm2724_vm6, %v1005_v11, %v977_v13  ;;  %v1098_v18 = vsel %vm2720_vm5, %v1000_v56, %v980_v21  ;;  %v1100_v3 = vsel %vm2720_vm5, %v1001_v0, %v981_v50 }
 0x348   : > { %v1976_v24 = vpack.c.bf16 %v1101_v31, %v1099_v19  ;;  %v1978_v51 = vpack.c.bf16 %v1100_v3, %v1098_v18  ;;  %v1103_v53 = vsel %vm2780_vm10, %v974_v26, %v1002_v41  ;;  %v1105_v36 = vsel %vm2780_vm10, %v975_v39, %v1003_v28  ;;  %v4162_v18 = vld [vmem:[#allocation12_spill] sm:$0xff] }
 0x349   : > { %v1988_v59 = vpack.c.bf16 %v1105_v36, %v1103_v53  ;;  %v4150_v26 = vunpack.i.l.bf16 %v3413_v9  ;;  %v4152_v41 = vunpack.i.h.bf16 %v3413_v9  ;;  %v4153_v28 = vunpack.i.h.bf16 %v3417_v12 }
 0x34a   : > { %1977 = vmatprep.subr.bf16.mxu1 %v1976_v24  ;;  %v1106_v42 = vsel %vm2776_vm9, %v980_v21, %v1000_v56  ;;  %v1108_v55 = vsel %vm2776_vm9, %v981_v50, %v1001_v0  ;;  %v4155_v16 = vunpack.i.l.bf16 %v3381_v49  ;;  %v4157_v30 = vunpack.i.h.bf16 %v3381_v49 }
 0x34b   : > { %1979 = vmatpush1.bf16.msra.mxu1 %v1978_v51  ;;  %v1994_v14 = vpack.c.bf16 %v1108_v55, %v1106_v42  ;;  %v4158_v49 = vunpack.i.l.bf16 %v3317_v40  ;;  %v4159_v0 = vunpack.i.l.bf16 %v3319_v62  ;;  %v4161_v19 = vunpack.i.h.bf16 %v3319_v62  ;;  %v4166_v51 = vld [vmem:[#allocation9_spill] sm:$0xff] }
 0x34c   : > { %1981 = vmatprep.subr.bf16.mxu1 %v3188_v38  ;;  %v1109_v38 = vsel %vm2780_vm10, %v977_v13, %v1005_v11  ;;  %v4160_v11 = vunpack.i.h.bf16 %v3317_v40  ;;  %v4168_v62 = vunpack.i.l.bf16 %v3503_v43  ;;  %v2006_v43 = vpack.c.bf16 %v3451_v7, %v3443_v6  ;;  %v4173_v7 = vld [vmem:[#allocation14_spill] sm:$0xff] }
 0x34e   : > { %v1051_v31 = vsel %vm256_vm3, %v4161_v19, %v4160_v11 }
 0x34f   : > { %1983 = vmatpush1.bf16.msra.mxu1 %v3186_v27  ;;  %v1107_v27 = vsel %vm2780_vm10, %v976_v58, %v1004_v48  ;;  %v4154_v58 = vunpack.i.l.bf16 %v3377_v60  ;;  %v1050_v48 = vsel %vm256_vm3, %v4159_v0, %v4158_v49  ;;  %v1161_v40 = vsel %vm2856_vm13, %v3425_v32, %v1051_v31 }
 0x350   : > { %1985 = vmatprep.subr.bf16.mxu1 %v3196_v29  ;;  %v4151_v29 = vunpack.i.l.bf16 %v3417_v12  ;;  %v1992_v5 = vpack.c.bf16 %v1109_v38, %v1107_v27  ;;  %v4156_v12 = vunpack.i.h.bf16 %v3377_v60  ;;  %v1159_v36 = vsel %vm2856_vm13, %v3421_v34, %v1050_v48  ;;  %v4172_v34 = vld [vmem:[#allocation15_spill] sm:$0xff] }
 0x351   : > { %v1028_v9 = vsel %vm249_vm2, %v4155_v16, %v4154_v58  ;;  %v4171_v27 = vunpack.i.h.bf16 %v3515_v44  ;;  %v880_v58 = vld [vmem:[#allocation3 + $0xa0] sm:$0xff]  ;;  %v883_v16 = vld [vmem:[#allocation3 + $0xb8] sm:$0xff] }
 0x352   : > { %v1076_v39 = vsel %vm263_vm0, %v4151_v29, %v4150_v26  ;;  %v1029_v13 = vsel %vm249_vm2, %v4157_v30, %v4156_v12  ;;  %v2002_v26 = vpack.c.bf16 %v4172_v34, %v3487_v15  ;;  %v2004_v29 = vpack.c.bf16 %v1161_v40, %v1159_v36 }
 0x353   : > { %1987 = vmatpush1.bf16.msra.mxu1 %v3198_v37  ;;  %v1077_v37 = vsel %vm263_vm0, %v4153_v28, %v4152_v41  ;;  %v1115_v21 = vsel %vm2724_vm6, %v1076_v39, %v1028_v9  ;;  %v1053_v38 = vsel %vm256_vm3, %v4171_v27, %v4170_v8  ;;  %v1123_v15 = vsel %vm2780_vm10, %v1028_v9, %v1076_v39  ;;  %v882_v39 = vld [vmem:[#allocation3 + $0xb0] sm:$0xff] }
 0x354   : > { %1989 = vmatprep.subr.bf16.mxu1 %v1988_v59  ;;  %v1117_v50 = vsel %vm2724_vm6, %v1077_v37, %v1029_v13  ;;  %v1155_v56 = vsel %vm2856_vm13, %v3387_v54, %v1115_v21  ;;  %v4163_v54 = vld [vmem:[#allocation11_spill] sm:$0xff]  ;;  %v4169_v59 = vunpack.i.l.bf16 %v3515_v44  ;;  %v1165_v41 = vsel %vm2856_vm13, %v3523_v57, %v1053_v38  ;;  %v1326_v12 = vpop.permute.xlu0 %1325 }
 0x355   : > { %v1157_v60 = vsel %vm2856_vm13, %v3393_v52, %v1117_v50  ;;  %v4164_v3 = vpack.c.bf16 %v4162_v18, %v4163_v54  ;;  %v4165_v52 = vld [vmem:[#allocation10_spill] sm:$0xff]  ;;  %v1125_v28 = vsel %vm2780_vm10, %v1029_v13, %v1077_v37  ;;  %v1171_v57 = vsel %vm2856_vm13, %v3587_v2, %v1123_v15  ;;  %v4176_v2 = vld [vmem:[#allocation16_spill] sm:$0xff] }
 0x356   : > { %v2000_v24 = vpack.c.bf16 %v1157_v60, %v1155_v56  ;;  %v4167_v53 = vpack.c.bf16 %v4165_v52, %v4166_v51  ;;  %v1052_v61 = vsel %vm256_vm3, %v4169_v59, %v4168_v62  ;;  %v1173_v6 = vsel %vm2856_vm13, %v3593_v23, %v1125_v28  ;;  %v3806_v18 = vld [vmem:[#allocation3 + $0xc0] ss:$8 sm:$0x3]  ;;  %v4177_v54 = vld [vmem:[#allocation6_spill] sm:$0xff] }
 0x357   : > { %1991 = vmatpush1.bf16.msra.mxu1 %v1990_v25  ;;  %v1163_v32 = vsel %vm2856_vm13, %v3519_v33, %v1052_v61  ;;  %v2010_v33 = vpack.c.bf16 %v3557_v17, %v3549_v20  ;;  %v878_v25 = vld [vmem:[#allocation3 + $0x90] sm:$0xff]  ;;  %v2014_v37 = vpack.c.bf16 %v3539_v4, %v3533_v10  ;;  %v2016_v20 = vpack.c.bf16 %v1173_v6, %v1171_v57  ;;  %v881_v17 = vld [vmem:[#allocation3 + $0xa8] sm:$0xff]  ;;  %v1321_v4 = vpop.permute.xlu1 %1320  ;;  %v1495_v52 = vld [vmem:[%s4087_s2] sm:$0x1] }
 0x358   : > { %1993 = vmatprep.subr.bf16.mxu1 %v1992_v5  ;;  %v2008_v44 = vpack.c.bf16 %v1165_v41, %v1163_v32  ;;  %v4174_v5 = vld [vmem:[#allocation13_spill] sm:$0xff]  ;;  %v2018_v55 = vpack.c.bf16 %v4176_v2, %v3597_v22  ;;  %v2509_v23 = vmov 0.0  }
 0x359   : > { %v4175_v42 = vpack.c.bf16 %v4173_v7, %v4174_v5 }
 0x35b   : > { %1995 = vmatpush1.bf16.msra.mxu1 %v1994_v14 }
 0x35c   : > { %1997 = vmatprep.subr.bf16.mxu1 %v4164_v3  ;;  %v4178_v3 = vsub.s32 1, %v4177_v54 }
 0x35f   : > { %1999 = vmatpush1.bf16.msra.mxu1 %v4167_v53 }
 0x360   : > { %2001 = vmatprep.subr.bf16.mxu1 %v2000_v24  ;;  %v1725_v24 = vrot.slane %v3806_v18, %v4178_v3 }
 0x362   : > { %1909 = vmatprep.mubr.msk.f32.mxu0 %vm768_vm14, %v1725_v24 }
 0x363   : > { %2003 = vmatpush1.bf16.msra.mxu1 %v2002_v26 }
 0x364   : > { %2005 = vmatprep.subr.bf16.mxu1 %v2004_v29 }
 0x367   : > { %2007 = vmatpush1.bf16.msra.mxu1 %v2006_v43 }
 0x368   : > { %2009 = vmatprep.subr.bf16.mxu1 %v2008_v44 }
 0x36b   : > { %2011 = vmatpush1.bf16.msra.mxu1 %v2010_v33 }
 0x36c   : > { %2013 = vmatprep.subr.bf16.mxu1 %v4175_v42 }
 0x36e   : > { %1400 = vmatmul.mubr.f32.vlgmr.msra.gmra.mrb[0].mxu1 %v878_v25 }
 0x36f   : > { %2015 = vmatpush1.bf16.msra.mxu1 %v2014_v37  ;;  %1405 = vmatprep.mubr.f32.mxu1 %v882_v39 }
 0x370   : > { %2017 = vmatprep.subr.bf16.mxu1 %v2016_v20 }
 0x372   : > { %1406 = vmatmul.mubr.f32.gmra.mrb[2].mxu1 %v881_v17 }
 0x373   : > { %2019 = vmatpush1.bf16.msra.mxu1 %v2018_v55  ;;  %1476 = vmatprep.mubr.f32.mxu1 %v2509_v23 }
 0x376   : > { %1907 = vmatmul.mubr.msk.f32.vlgmr.msra.gmra.mrb[0].mxu1 %vm1328_vm15, %v880_v58 }
 0x377   : > { %1482 = vmatprep.mubr.f32.mxu1 %v2509_v23 }
 0x37a   : > { %1908 = vmatmul.mubr.msk.f32.gmra.mrb[2].mxu1 %vm1328_vm15, %v883_v16 }
 0x449   : > { %v1478_v10 = vpop.f32.mrb[0].mxu1 }
 0x44a   : > { %v1480_v9 = vpop.f32.mrb[1].mxu1  ;;  %v2056_v30 = vadd.f32 %v1478_v10, %v1321_v4 }
 0x44b   : > { %v2057_v13 = vadd.f32 %v1480_v9, %v1321_v4 }
 0x44c   : > { %v1489_v56 = vmax.f32 %v2056_v30, 0.0 }
 0x44d   : > { %v1484_v21 = vpop.f32.mrb[2].mxu1  ;;  %v1490_v49 = vmax.f32 %v2057_v13, 0.0 }
 0x44e   : > { %v2058_v50 = vadd.f32 %v1484_v21, %v1326_v12  ;;  %v1486_v14 = vpop.f32.mrb[3].mxu1 }
 0x44f   : > { %v2059_v22 = vadd.f32 %v1486_v14, %v1326_v12 }
 0x450   : > { %v1491_v60 = vmax.f32 %v2058_v50, 0.0 }
 0x451   : > { %v1492_v0 = vmax.f32 %v2059_v22, 0.0 }
 0x452   : > { %v2369_v48 = vpack.i.bf16 %v1491_v60, %v1489_v56  ;;  %v3790_v31 = vpack.c.bf16 %v1491_v60, %v1489_v56 }
 0x453   : > { %v2404_v11 = vpack.i.bf16 %v1492_v0, %v1490_v49  ;;  %v3788_v19 = vpack.c.bf16 %v1492_v0, %v1490_v49 }
 0x454   : > { %2370 = vrot.lane.b32.xlu0 %v2369_v48, %s2496_s8  ;;  %2365 = vrot.lane.b32.xlu1 %v2369_v48, %s2494_s7 }
 0x458   : > { %2375 = vrot.lane.b32.xlu0 %v2369_v48, %s2497_s9  ;;  %2405 = vrot.lane.b32.xlu1 %v2404_v11, %s2494_s7  ;;  %s180_s7 = scalar_lea.vmem %s4088_s3, %s1901_s30 }
 0x45c   : > { %2380 = vrot.lane.b32.xlu0 %v2369_v48, %s2498_s10  ;;  %2410 = vrot.lane.b32.xlu1 %v2404_v11, %s2496_s8 }
 0x460   : > { %2385 = vrot.lane.b32.xlu0 %v2369_v48, %s2499_s11  ;;  %2415 = vrot.lane.b32.xlu1 %v2404_v11, %s2497_s9 }
 0x464   : > { %2390 = vrot.lane.b32.xlu0 %v2369_v48, %s2501_s14  ;;  %2420 = vrot.lane.b32.xlu1 %v2404_v11, %s2498_s10 }
 0x468   : > { %2395 = vrot.lane.b32.xlu0 %v2369_v48, %s2503_s15  ;;  %2425 = vrot.lane.b32.xlu1 %v2404_v11, %s2499_s11 }
 0x46c   : > { %2400 = vrot.lane.b32.xlu0 %v2369_v48, %s2505_s16  ;;  %2430 = vrot.lane.b32.xlu1 %v2404_v11, %s2501_s14 }
 0x470   : > { %2435 = vrot.lane.b32.xlu1 %v2404_v11, %s2503_s15  ;;  %1714 = vperm.xlu0 %2444, %v1495_v52  }
 0x474   : > { %2440 = vrot.lane.b32.xlu1 %v2404_v11, %s2505_s16 }
 0x4c6   : > { %v2371_v51 = vpop.permute.xlu0 %2370  ;;  %v2366_v53 = vpop.permute.xlu1 %2365 }
 0x4c7   : > { %v2373_v62 = vunpack.i.h.bf16 %v2371_v51  ;;  %v2372_v59 = vunpack.i.l.bf16 %v2371_v51  ;;  %v2368_v29 = vunpack.i.h.bf16 %v2366_v53  ;;  %v2367_v32 = vunpack.i.l.bf16 %v2366_v53 }
 0x4ca   : > { %v3815_v36 = vpop.permute.xlu0 %2375  ;;  %v2406_v40 = vpop.permute.xlu1 %2405 }
 0x4cb   : > { %v2408_v27 = vunpack.i.h.bf16 %v2406_v40  ;;  %v2407_v38 = vunpack.i.l.bf16 %v2406_v40  ;;  %v2378_v5 = vunpack.i.h.bf16 %v3815_v36  ;;  %v2377_v42 = vunpack.i.l.bf16 %v3815_v36 }
 0x4cd   : > { %v1504_v28 = vsel %vm214_vm4, %v2367_v32, %v2407_v38  ;;  %v1505_v33 = vsel %vm214_vm4, %v2368_v29, %v2408_v27  ;;  %v1506_v58 = vsel %vm214_vm4, %v2407_v38, %v2367_v32  ;;  %v1507_v13 = vsel %vm214_vm4, %v2408_v27, %v2368_v29 }
 0x4ce   : > { %v3817_v61 = vpop.permute.xlu0 %2380  ;;  %v2411_v8 = vpop.permute.xlu1 %2410 }
 0x4cf   : > { %v2413_v34 = vunpack.i.h.bf16 %v2411_v8  ;;  %v2412_v26 = vunpack.i.l.bf16 %v2411_v8  ;;  %v2383_v39 = vunpack.i.h.bf16 %v3817_v61  ;;  %v2382_v17 = vunpack.i.l.bf16 %v3817_v61 }
 0x4d1   : > { %v1529_v41 = vsel %vm228_vm1, %v2373_v62, %v2413_v34  ;;  %v1528_v43 = vsel %vm228_vm1, %v2372_v59, %v2412_v26  ;;  %v1530_v2 = vsel %vm228_vm1, %v2412_v26, %v2372_v59  ;;  %v1531_v16 = vsel %vm228_vm1, %v2413_v34, %v2373_v62 }
 0x4d2   : > { %v2386_v44 = vpop.permute.xlu0 %2385  ;;  %v3823_v15 = vpop.permute.xlu1 %2415  ;;  %v3831_v25 = vsel %vm2724_vm6, %v1528_v43, %v1504_v28  ;;  %v3835_v57 = vsel %vm2724_vm6, %v1529_v41, %v1505_v33  ;;  %v1592_v21 = vsel %vm2720_vm5, %v1530_v2, %v1506_v58  ;;  %v1594_v56 = vsel %vm2720_vm5, %v1531_v16, %v1507_v13 }
 0x4d3   : > { %v2418_v6 = vunpack.i.h.bf16 %v3823_v15  ;;  %v2417_v7 = vunpack.i.l.bf16 %v3823_v15  ;;  %v2020_v37 = vpack.c.bf16 %v3835_v57, %v3831_v25  ;;  %v2387_v60 = vunpack.i.l.bf16 %v2386_v44 }
 0x4d4   : > { %v2388_v48 = vunpack.i.h.bf16 %v2386_v44  ;;  %v3913_v59 = vsel %vm2780_vm10, %v1504_v28, %v1528_v43  ;;  %v3931_v43 = vsel %vm2780_vm10, %v1505_v33, %v1529_v41  ;;  %v1596_v33 = vsel %vm2776_vm9, %v1506_v58, %v1530_v2 }
 0x4d5   : > { %2021 = vmatprep.subr.bf16.mxu0 %v2020_v37  ;;  %v1565_v10 = vsel %vm249_vm2, %v2378_v5, %v2418_v6  ;;  %v1564_v9 = vsel %vm249_vm2, %v2377_v42, %v2417_v7  ;;  %v1566_v61 = vsel %vm249_vm2, %v2417_v7, %v2377_v42 }
 0x4d6   : > { %v3844_v20 = vpop.permute.xlu1 %2420  ;;  %v3855_v4 = vpop.permute.xlu0 %2390 }
 0x4d7   : > { %v2423_v55 = vunpack.i.h.bf16 %v3844_v20  ;;  %v2422_v23 = vunpack.i.l.bf16 %v3844_v20  ;;  %v2393_v8 = vunpack.i.h.bf16 %v3855_v4  ;;  %v2392_v27 = vunpack.i.l.bf16 %v3855_v4 }
 0x4d9   : > { %v1589_v12 = vsel %vm263_vm0, %v2383_v39, %v2423_v55  ;;  %v1588_v30 = vsel %vm263_vm0, %v2382_v17, %v2422_v23  ;;  %v1590_v45 = vsel %vm263_vm0, %v2422_v23, %v2382_v17 }
 0x4da   : > { %v3887_v50 = vsel %vm2720_vm5, %v1588_v30, %v1564_v9  ;;  %v3891_v14 = vsel %vm2720_vm5, %v1589_v12, %v1565_v10  ;;  %v2426_v22 = vpop.permute.xlu1 %2425  ;;  %v2396_v53 = vpop.permute.xlu0 %2395  ;;  %v3921_v26 = vsel %vm2776_vm9, %v1564_v9, %v1588_v30  ;;  %v3925_v29 = vsel %vm2776_vm9, %v1565_v10, %v1589_v12 }
 0x4db   : > { %v2428_v49 = vunpack.i.h.bf16 %v2426_v22  ;;  %v2427_v0 = vunpack.i.l.bf16 %v2426_v22  ;;  %v1616_v3 = vsel %vm2747_vm8, %v3887_v50, %v1592_v21  ;;  %v1618_v24 = vsel %vm2747_vm8, %v3891_v14, %v1594_v56 }
 0x4dc   : > { %v2022_v52 = vpack.c.bf16 %v1618_v24, %v1616_v3  ;;  %v1598_v10 = vsel %vm2776_vm9, %v1507_v13, %v1531_v16  ;;  %v1624_v22 = vsel %vm2747_vm8, %v3921_v26, %v1596_v33  ;;  %v2028_v56 = vpack.c.bf16 %v3931_v43, %v3913_v59 }
 0x4dd   : > { %v3903_v51 = vsel %vm221_vm7, %v2387_v60, %v2427_v0  ;;  %v3909_v62 = vsel %vm221_vm7, %v2388_v48, %v2428_v49  ;;  %v1519_v44 = vsel %vm221_vm7, %v2428_v49, %v2388_v48  ;;  %v1518_v28 = vsel %vm221_vm7, %v2427_v0, %v2387_v60 }
 0x4de   : > { %v3905_v40 = vpop.permute.xlu1 %2430  ;;  %2023 = vmatpush1.bf16.msra.mxu0 %v2022_v52  ;;  %v2024_v32 = vpack.c.bf16 %v3909_v62, %v3903_v51  ;;  %v1626_v2 = vsel %vm2747_vm8, %v3925_v29, %v1598_v10  ;;  %v2401_v58 = vpop.permute.xlu0 %2400  ;;  %v2398_v60 = vunpack.i.h.bf16 %v2396_v53  ;;  %v2397_v49 = vunpack.i.l.bf16 %v2396_v53 }
 0x4df   : > { %v2433_v38 = vunpack.i.h.bf16 %v3905_v40  ;;  %v2432_v34 = vunpack.i.l.bf16 %v3905_v40  ;;  %v2030_v48 = vpack.c.bf16 %v1626_v2, %v1624_v22  ;;  %v2403_v3 = vunpack.i.h.bf16 %v2401_v58 }
 0x4e0   : > { %2025 = vmatprep.subr.bf16.mxu0 %v2024_v32  ;;  %v2402_v24 = vunpack.i.l.bf16 %v2401_v58  ;;  %v1609_v17 = vsel %vm2724_vm6, %v1590_v45, %v1566_v61  ;;  %v2046_v23 = vpack.c.bf16 %v3891_v14, %v3887_v50  ;;  %v2054_v1 = vpack.c.bf16 %v3925_v29, %v3921_v26  ;;  %v4180_v50 = vld [vmem:[#allocation7_spill] sm:$0xff] }
 0x4e1   : > { %v3943_v37 = vsel %vm256_vm3, %v2393_v8, %v2433_v38  ;;  %v3951_v41 = vsel %vm256_vm3, %v2392_v27, %v2432_v34  ;;  %v1579_v46 = vsel %vm256_vm3, %v2433_v38, %v2393_v8  ;;  %v1578_v63 = vsel %vm256_vm3, %v2432_v34, %v2392_v27 }
 0x4e2   : > { %v2436_v9 = vpop.permute.xlu1 %2435  ;;  %v1620_v12 = vsel %vm2747_vm8, %v3951_v41, %v1518_v28  ;;  %v1622_v30 = vsel %vm2747_vm8, %v3943_v37, %v1519_v44  ;;  %v1635_v42 = vsel %vm2856_vm13, %v3909_v62, %v1579_v46  ;;  %v2050_v62 = vpack.c.bf16 %v3943_v37, %v3951_v41 }
 0x4e3   : > { %v2026_v21 = vpack.c.bf16 %v1622_v30, %v1620_v12  ;;  %v2438_v16 = vunpack.i.h.bf16 %v2436_v9  ;;  %v2437_v13 = vunpack.i.l.bf16 %v2436_v9  ;;  %v1721_v14 = vrot.slane %v3806_v18, %v4180_v50 }
 0x4e5   : > { %2027 = vmatpush1.bf16.msra.mxu0 %v2026_v21  ;;  %v1543_v11 = vsel %vm235_vm11, %v2438_v16, %v2398_v60  ;;  %v1542_v44 = vsel %vm235_vm11, %v2437_v13, %v2397_v49  ;;  %v1541_v9 = vsel %vm235_vm11, %v2398_v60, %v2438_v16  ;;  %v1540_v12 = vsel %vm235_vm11, %v2397_v49, %v2437_v13 }
 0x4e6   : > { %v2441_v0 = vpop.permute.xlu1 %2440  ;;  %2029 = vmatprep.subr.bf16.mxu0 %v2028_v56  ;;  %v1591_v16 = vsel %vm263_vm0, %v2423_v55, %v2383_v39  ;;  %v1567_v13 = vsel %vm249_vm2, %v2418_v6, %v2378_v5  ;;  %v1629_v5 = vsel %vm2856_vm13, %v3831_v25, %v1609_v17  ;;  %v1613_v55 = vsel %vm2780_vm10, %v1566_v61, %v1590_v45 }
 0x4e7   : > { %v2443_v52 = vunpack.i.h.bf16 %v2441_v0  ;;  %v2442_v32 = vunpack.i.l.bf16 %v2441_v0  ;;  %v1611_v36 = vsel %vm2724_vm6, %v1591_v16, %v1567_v13  ;;  %v1615_v35 = vsel %vm2780_vm10, %v1567_v13, %v1591_v16 }
 0x4e8   : > { %v1639_v40 = vsel %vm2856_vm13, %v3931_v43, %v1615_v35  ;;  %v2510_v43 = vmov 1966171168  }
 0x4e9   : > { %v1553_v28 = vsel %vm242_vm12, %v2403_v3, %v2443_v52  ;;  %v1555_v33 = vsel %vm242_vm12, %v2443_v52, %v2403_v3  ;;  %v1552_v53 = vsel %vm242_vm12, %v2402_v24, %v2442_v32  ;;  %v1554_v10 = vsel %vm242_vm12, %v2442_v32, %v2402_v24  ;;  %2031 = vmatpush1.bf16.msra.mxu0 %v2030_v48 }
 0x4ea   : > { %v1600_v30 = vsel %vm2720_vm5, %v1552_v53, %v1542_v44  ;;  %v1602_v21 = vsel %vm2720_vm5, %v1553_v28, %v1543_v11  ;;  %v1601_v22 = vsel %vm2724_vm6, %v1554_v10, %v1540_v12  ;;  %v1603_v2 = vsel %vm2724_vm6, %v1555_v33, %v1541_v9 }
 0x4eb   : > { %v2034_v58 = vpack.c.bf16 %v1602_v21, %v1600_v30  ;;  %v2032_v56 = vpack.c.bf16 %v1603_v2, %v1601_v22  ;;  %v1605_v39 = vsel %vm2780_vm10, %v1540_v12, %v1554_v10  ;;  %v1607_v20 = vsel %vm2780_vm10, %v1541_v9, %v1555_v33 }
 0x4ec   : > { %v1604_v15 = vsel %vm2776_vm9, %v1542_v44, %v1552_v53  ;;  %v1606_v6 = vsel %vm2776_vm9, %v1543_v11, %v1553_v28  ;;  %v2040_v7 = vpack.c.bf16 %v1607_v20, %v1605_v39  ;;  %v1810_v37 = vunpack.c.l.s4 %v2510_v43 }
 0x4ed   : > { %2033 = vmatprep.subr.bf16.mxu0 %v2032_v56  ;;  %v4181_v52 = vlaneseq }
 0x4ee   : > { %2035 = vmatpush1.bf16.msra.mxu0 %v2034_v58  ;;  %v1811_v60 = vunpack.c.0.s8 %v1810_v37 }
 0x4ef   : > { %2037 = vmatprep.subr.bf16.mxu0 %v3788_v19  ;;  %v1631_v19 = vsel %vm2856_vm13, %v3835_v57, %v1611_v36  ;;  %v1633_v57 = vsel %vm2856_vm13, %v3903_v51, %v1578_v63  ;;  %v1637_v51 = vsel %vm2856_vm13, %v3913_v59, %v1613_v55  ;;  %v1715_v59 = vpop.permute.xlu0 %1714  ;;  %vm1826_vm0 = vcmp.lt.s32.totalorder %v4181_v52, 256 }
 0x4f0   : > { %v2044_v25 = vpack.c.bf16 %v1631_v19, %v1629_v5  ;;  %v2048_v4 = vpack.c.bf16 %v1635_v42, %v1633_v57  ;;  %v2052_v8 = vpack.c.bf16 %v1639_v40, %v1637_v51  ;;  %v1814_v18 = vsub.s32 %v1811_v60, %v4177_v54 }
 0x4f2   : > { %2039 = vmatpush1.bf16.msra.mxu0 %v3790_v31  ;;  %v2042_v31 = vpack.c.bf16 %v1606_v6, %v1604_v15 }
 0x4f3   : > { %2041 = vmatprep.subr.bf16.mxu0 %v2040_v7 }
 0x4f6   : > { %2043 = vmatpush1.bf16.msra.mxu0 %v2042_v31 }
 0x4f7   : > { %2045 = vmatprep.subr.bf16.mxu0 %v2044_v25 }
 0x4fa   : > { %2047 = vmatpush1.bf16.msra.mxu0 %v2046_v23 }
 0x4fb   : > { %2049 = vmatprep.subr.bf16.mxu0 %v2048_v4 }
 0x4fe   : > { %2051 = vmatpush1.bf16.msra.mxu0 %v2050_v62 }
 0x4ff   : > { %2053 = vmatprep.subr.bf16.mxu0 %v2052_v8 }
 0x502   : > { %2055 = vmatpush1.bf16.msra.mxu0 %v2054_v1 }
 0x505   : > { %1794 = vmatmul.mubr.f32.vlgmr.msra.gmra.mrb[8].mxu0 %v1721_v14 }
 0x5d8   : > { %v1795_v27 = vpop.f32.mrb[8].mxu0 }
 0x5d9   : > { %v1796_v38 = vadd.f32 %v1795_v27, %v1715_v59  ;;  %v1797_v47 = vpop.f32.mrb[9].mxu0 }
 0x5da   : > { %v1798_v34 = vadd.f32 %v1797_v47, %v1715_v59 }
 0x5db   : > { %2445 = vtanh.f32 %v1796_v38 }
 0x5dc   : > { %2447 = vtanh.f32 %v1798_v34 }
 0x5e5   : > { %v2446_v41 = vpop.eup %2445 }
 0x5e6   : > { %v2448_v49 = vpop.eup %2447  ;;  %v1802_v0 = vmul.f32 0.5, %v2446_v41 }
 0x5e7   : > { %v1803_v26 = vmul.f32 0.5, %v2448_v49 }
 0x5e8   : > { %v1804_v29 = vadd.f32 0.5, %v1802_v0 }
 0x5e9   : > { %v1805_v48 = vadd.f32 0.5, %v1803_v26 }
 0x5eb   : > { %v1808_v3 = vcombine.low %v1804_v29, %v1805_v48 }
 0x5ed   : > { %v1815_v24 = vrot.slane %v1808_v3, %v1814_v18 }
 0x5ef   : > { %v1822_v32 = vrot.slane %v1815_v24, %v1814_v18 }
 0x5f1   : > { %1828 = vst.msk [vmem:[%s180_s7] sm:$0x3] %vm1826_vm0, %v1822_v32 }
 0x5f2 PF: > { %s14_s12 = sadd.s32 1, %s2487_s12  }
 0x5f3   : > { %p11_p3 = scmp.ge.s32.totalorder %s14_s12, 4  }
 0x5f5   :  { %13 = sbr.rel (!%p11_p3) target bundleno = 1 (0x1), region = 68 }
 0x5fc   :  { %1848 = vsyncpa [#allocation4], 1 }
 0x5fd   :  { %1850 = vsyncpa [#allocation4 + $0x1], 1 }

</bundles_post_ra>
